<compile_context>
chip_gen: v5e
topology: v5e:2x2
jax: 0.10.0
libtpu: 0.0.40
codegen_flags: <defaults>
</compile_context>

<pallas_src>
import functools

import jax
import jax.numpy as jnp
import numpy as np
from jax import lax
from jax.experimental import pallas as pl
from jax.experimental.pallas import tpu as pltpu

_VMEM_LIMIT = 48 * 1024 * 1024   # conservative: fits v7x (64 MiB physical VMEM)


def _pick_tile(dim, target, align):
    """Largest tile <= target that divides dim and is a multiple of align;
    falls back to the full dim (always a legal block size)."""
    if dim <= target:
        return dim
    for t in range(target, align - 1, -1):
        if t % align == 0 and dim % t == 0:
            return t
    return dim


# --------------------- fused LayerNorm + matmul (+act) ----------------------
# out[c] = act(LN(x) @ w3[c] + b3[c])   x:(M,K), w3:(C,K,Nc), b3:(C,Nc)
# Grid (Mtiles, C, Nc tiles); LN computed once per row-tile into VMEM scratch.

def _ln_matmul_kernel(x_ref, g_ref, b_ref, w_ref, bias_ref, o_ref, h_ref,
                      *, eps, act):
    c = pl.program_id(1)
    j = pl.program_id(2)

    @pl.when((c == 0) & (j == 0))
    def _():
        # LayerNorm prologue in f32, reused for all (c, j) tiles of this row-tile.
        x = x_ref[...].astype(jnp.float32)
        mean = jnp.mean(x, axis=-1, keepdims=True)
        xc = x - mean
        var = jnp.mean(xc * xc, axis=-1, keepdims=True)
        h_ref[...] = (xc * lax.rsqrt(var + eps)
                      * g_ref[...].astype(jnp.float32)
                      + b_ref[...].astype(jnp.float32))

    h = h_ref[...].astype(w_ref.dtype)            # MXU operands in native dtype
    acc = jnp.dot(h, w_ref[0], preferred_element_type=jnp.float32)
    acc = acc + bias_ref[0].astype(jnp.float32)
    if act == "quick_gelu":                        # CLIP QuickGELU
        acc = acc * jax.nn.sigmoid(1.702 * acc)
    o_ref[0] = acc.astype(o_ref.dtype)


def ln_matmul(x, gamma, beta, w3, b3, eps=1e-5, act=None,
              tm_target=256, tn_target=512):
    M, K = x.shape
    C, K2, Nc = w3.shape
    assert K2 == K
    tm = _pick_tile(M, tm_target, 8)
    tn = _pick_tile(Nc, tn_target, 128)
    g = gamma.reshape(1, K)
    b = beta.reshape(1, K)
    b3r = b3.reshape(C, 1, Nc)
    grid = (M // tm, C, Nc // tn)
    return pl.pallas_call(
        functools.partial(_ln_matmul_kernel, eps=eps, act=act),
        out_shape=jax.ShapeDtypeStruct((C, M, Nc), x.dtype),
        grid=grid,
        in_specs=[
            pl.BlockSpec((tm, K), lambda i, c, j: (i, 0)),
            pl.BlockSpec((1, K), lambda i, c, j: (0, 0)),
            pl.BlockSpec((1, K), lambda i, c, j: (0, 0)),
            pl.BlockSpec((1, K, tn), lambda i, c, j: (c, 0, j)),
            pl.BlockSpec((1, 1, tn), lambda i, c, j: (c, 0, j)),
        ],
        out_specs=pl.BlockSpec((1, tm, tn), lambda i, c, j: (c, i, j)),
        scratch_shapes=[pltpu.VMEM((tm, K), jnp.float32)],
        compiler_params=pltpu.CompilerParams(
            dimension_semantics=("parallel", "arbitrary", "arbitrary"),
            vmem_limit_bytes=_VMEM_LIMIT),
    )(x, g, b, w3, b3r)


# ----------------- K-tiled matmul with bias + residual fused ----------------

def _matmul_res_kernel(a_ref, w_ref, bias_ref, res_ref, o_ref, acc_ref):
    k = pl.program_id(2)

    @pl.when(k == 0)
    def _():
        acc_ref[...] = jnp.zeros_like(acc_ref)

    acc_ref[...] += jnp.dot(a_ref[...], w_ref[...],
                            preferred_element_type=jnp.float32)

    @pl.when(k == pl.num_programs(2) - 1)
    def _():
        out = (acc_ref[...] + bias_ref[...].astype(jnp.float32)
               + res_ref[...].astype(jnp.float32))     # residual added in f32
        o_ref[...] = out.astype(o_ref.dtype)


def matmul_residual(a, w, bias, residual,
                    tm_target=256, tn_target=512, tk_target=512):
    M, K = a.shape
    K2, Nc = w.shape
    assert K2 == K and residual.shape == (M, Nc)
    tm = _pick_tile(M, tm_target, 8)
    tn = _pick_tile(Nc, tn_target, 128)
    tk = _pick_tile(K, tk_target, 128)
    b2 = bias.reshape(1, Nc)
    grid = (M // tm, Nc // tn, K // tk)
    return pl.pallas_call(
        _matmul_res_kernel,
        out_shape=jax.ShapeDtypeStruct((M, Nc), a.dtype),
        grid=grid,
        in_specs=[
            pl.BlockSpec((tm, tk), lambda i, j, k: (i, k)),
            pl.BlockSpec((tk, tn), lambda i, j, k: (k, j)),
            pl.BlockSpec((1, tn), lambda i, j, k: (0, j)),
            pl.BlockSpec((tm, tn), lambda i, j, k: (i, j)),
        ],
        out_specs=pl.BlockSpec((tm, tn), lambda i, j, k: (i, j)),
        scratch_shapes=[pltpu.VMEM((tm, tn), jnp.float32)],
        compiler_params=pltpu.CompilerParams(
            dimension_semantics=("parallel", "parallel", "arbitrary"),
            vmem_limit_bytes=_VMEM_LIMIT),
    )(a, w, b2, residual)


# --------------------------- row-tiled LayerNorm ----------------------------

def _layernorm_kernel(x_ref, g_ref, b_ref, o_ref, *, eps):
    x = x_ref[...].astype(jnp.float32)
    mean = jnp.mean(x, axis=-1, keepdims=True)
    xc = x - mean
    var = jnp.mean(xc * xc, axis=-1, keepdims=True)
    y = (xc * lax.rsqrt(var + eps) * g_ref[...].astype(jnp.float32)
         + b_ref[...].astype(jnp.float32))
    o_ref[...] = y.astype(o_ref.dtype)


def layernorm(x, gamma, beta, eps=1e-5, tm_target=512):
    M, D = x.shape
    tm = _pick_tile(M, tm_target, 8)
    g = gamma.reshape(1, D)
    b = beta.reshape(1, D)
    return pl.pallas_call(
        functools.partial(_layernorm_kernel, eps=eps),
        out_shape=jax.ShapeDtypeStruct((M, D), x.dtype),
        grid=(M // tm,),
        in_specs=[pl.BlockSpec((tm, D), lambda i: (i, 0)),
                  pl.BlockSpec((1, D), lambda i: (0, 0)),
                  pl.BlockSpec((1, D), lambda i: (0, 0))],
        out_specs=pl.BlockSpec((tm, D), lambda i: (i, 0)),
        compiler_params=pltpu.CompilerParams(
            dimension_semantics=("parallel",), vmem_limit_bytes=_VMEM_LIMIT),
    )(x, g, b)


# ------------------------------- attention ----------------------------------
# qkv: (3, N, L, D); head h occupies columns [h*hd, (h+1)*hd).  Each program
# processes a lane-dense group of `hpb` heads of one sequence — head selection
# is done entirely by the BlockSpec index_map (no JAX-side transposes).

def _attn_kernel(qkv_ref, o_ref, *, hd, scale):
    q = qkv_ref[0, 0] * scale              # fold softmax scale into (L, ghd) q
    k = qkv_ref[1, 0]
    v = qkv_ref[2, 0]
    L, ghd = q.shape
    hpb = ghd // hd
    row = lax.broadcasted_iota(jnp.int32, (L, L), 0)
    col = lax.broadcasted_iota(jnp.int32, (L, L), 1)
    causal = col <= row                    # CLIP causal text mask
    # q @ k.T via dot_general contracting dim (no explicit XLU transpose of k).
    qkT_dims = (((1,), (1,)), ((), ()))
    outs = []
    for h in range(hpb):
        sl = slice(h * hd, (h + 1) * hd)
        s = lax.dot_general(q[:, sl], k[:, sl], qkT_dims,
                            preferred_element_type=jnp.float32)   # (L, L) f32
        s = jnp.where(causal, s, -jnp.inf)
        s = s - jnp.max(s, axis=-1, keepdims=True)
        p = jnp.exp(s)
        denom = jnp.sum(p, axis=-1, keepdims=True)
        o = jnp.dot(p.astype(v.dtype), v[:, sl],
                    preferred_element_type=jnp.float32)           # (L, hd)
        outs.append(o * pl.reciprocal(denom))  # normalize after p@v: O(L*hd)
    # single lane-dense store (unmasked vst) instead of hd-wide masked stores
    o_ref[0] = jnp.concatenate(outs, axis=-1).astype(o_ref.dtype)


def _heads_per_block(n_heads, hd):
    if hd % 128 == 0:
        return 1
    if 128 % hd == 0:
        hpb = 128 // hd
        if hpb <= n_heads and n_heads % hpb == 0:
            return hpb                     # lane-dense: hpb*hd == 128
    return n_heads                         # fall back to all heads (block = D)


def attention(qkv, n_heads, scale):
    _, N, L, D = qkv.shape
    hd = D // n_heads
    hpb = _heads_per_block(n_heads, hd)
    ghd = hpb * hd
    grid = (N, n_heads // hpb)
    return pl.pallas_call(
        functools.partial(_attn_kernel, hd=hd, scale=scale),
        out_shape=jax.ShapeDtypeStruct((N, L, D), qkv.dtype),
        grid=grid,
        in_specs=[pl.BlockSpec((3, 1, L, ghd), lambda n, g: (0, n, 0, g))],
        out_specs=pl.BlockSpec((1, L, ghd), lambda n, g: (n, 0, g)),
        compiler_params=pltpu.CompilerParams(
            dimension_semantics=("parallel", "parallel"),
            vmem_limit_bytes=_VMEM_LIMIT),
    )(qkv)


# ---------------------------- model (glue + kernels) ------------------------

def residual_block(xr, p, N, L, n_heads):
    # xr: (N*L, D) residual stream — one CLIP ResidualAttentionBlock
    M, D = xr.shape
    hd = D // n_heads

    # --- attention branch: fused LN1 + QKV projection -> (3, M, D) ---
    w3 = p["in_proj_w"].reshape(D, 3, D).transpose(1, 0, 2)   # tiny weight reshape
    b3 = p["in_proj_b"].reshape(3, D)
    qkv = ln_matmul(xr, p["ln1_g"], p["ln1_b"], w3, b3)       # (3, M, D)
    o = attention(qkv.reshape(3, N, L, D), n_heads, hd ** -0.5)  # (N, L, D)
    xr = matmul_residual(o.reshape(M, D),
                         p["out_proj_w"], p["out_proj_b"], xr)

    # --- MLP branch: fused LN2 + c_fc + QuickGELU, then c_proj (+residual) ---
    h = ln_matmul(xr, p["ln2_g"], p["ln2_b"],
                  p["fc_w"][None], p["fc_b"][None], act="quick_gelu")[0]
    xr = matmul_residual(h, p["proj_w"], p["proj_b"], xr)
    return xr


@functools.partial(jax.jit, static_argnums=(3,))
def text_encoder_forward(params, prompts, tokenized_prompts, n_heads):
    N, L, D = prompts.shape
    # positional-embedding add: tiny elementwise op, fused by XLA under jit.
    x = (prompts + params["pos_emb"][None]).reshape(N * L, D)
    for blk in params["blocks"]:                               # transformer
        x = residual_block(x, blk, N, L, n_heads)
    x = layernorm(x, params["lnf_g"], params["lnf_b"])         # ln_final
    x = x.reshape(N, L, D)
    eot = jnp.argmax(tokenized_prompts, axis=-1)               # (N,)
    pooled = x[jnp.arange(N), eot]                             # EOT gather (glue)
    # final (N, D) @ (D, E): N is tiny -> launch-overhead-bound, leave to XLA.
    return pooled @ params["text_proj"]


# ---------------------------- pure-JAX reference ----------------------------

def reference_forward(params, prompts, tokenized_prompts, n_heads):
    N, L, D = prompts.shape
    hd = D // n_heads

    def ln(x, g, b, eps=1e-5):
        m = x.mean(-1, keepdims=True)
        v = ((x - m) ** 2).mean(-1, keepdims=True)
        return (x - m) / jnp.sqrt(v + eps) * g + b

    x = prompts + params["pos_emb"][None]
    mask = jnp.tril(jnp.ones((L, L), bool))
    for p in params["blocks"]:
        h = ln(x, p["ln1_g"], p["ln1_b"])
        qkv = h @ p["in_proj_w"] + p["in_proj_b"]
        q, k, v = jnp.split(qkv, 3, axis=-1)
        q = q.reshape(N, L, n_heads, hd).transpose(0, 2, 1, 3)
        k = k.reshape(N, L, n_heads, hd).transpose(0, 2, 1, 3)
        v = v.reshape(N, L, n_heads, hd).transpose(0, 2, 1, 3)
        s = jnp.einsum("nhqd,nhkd->nhqk", q, k) * hd ** -0.5
        s = jnp.where(mask[None, None], s, -jnp.inf)
        patt = jax.nn.softmax(s, axis=-1)
        o = jnp.einsum("nhqk,nhkd->nhqd", patt, v).transpose(0, 2, 1, 3).reshape(N, L, D)
        x = x + (o @ p["out_proj_w"] + p["out_proj_b"])
        h2 = ln(x, p["ln2_g"], p["ln2_b"])
        h2 = h2 @ p["fc_w"] + p["fc_b"]
        h2 = h2 * jax.nn.sigmoid(1.702 * h2)
        x = x + (h2 @ p["proj_w"] + p["proj_b"])
    x = ln(x, params["lnf_g"], params["lnf_b"])
    eot = jnp.argmax(tokenized_prompts, axis=-1)
    return x[jnp.arange(N), eot] @ params["text_proj"]


# --------------------------------- main --------------------------------------

def init_params(key, L, D, E, n_layers):
    keys = jax.random.split(key, 2 + 8 * n_layers)
    ki = iter(keys)
    s = 0.02
    params = {
        "pos_emb": s * jax.random.normal(next(ki), (L, D), jnp.float32),
        "lnf_g": jnp.ones((D,), jnp.float32),
        "lnf_b": jnp.zeros((D,), jnp.float32),
        "text_proj": s * jax.random.normal(next(ki), (D, E), jnp.float32),
        "blocks": [],
    }
    for _ in range(n_layers):
        blk = {
            "ln1_g": jnp.ones((D,), jnp.float32),
            "ln1_b": jnp.zeros((D,), jnp.float32),
            "in_proj_w": s * jax.random.normal(next(ki), (D, 3 * D), jnp.float32),
            "in_proj_b": s * jax.random.normal(next(ki), (3 * D,), jnp.float32),
            "out_proj_w": s * jax.random.normal(next(ki), (D, D), jnp.float32),
            "out_proj_b": s * jax.random.normal(next(ki), (D,), jnp.float32),
            "ln2_g": jnp.ones((D,), jnp.float32),
            "ln2_b": jnp.zeros((D,), jnp.float32),
            "fc_w": s * jax.random.normal(next(ki), (D, 4 * D), jnp.float32),
            "fc_b": s * jax.random.normal(next(ki), (4 * D,), jnp.float32),
            "proj_w": s * jax.random.normal(next(ki), (4 * D, D), jnp.float32),
            "proj_b": s * jax.random.normal(next(ki), (D,), jnp.float32),
        }
        params["blocks"].append(blk)
    return params


if __name__ == "__main__":
    N, L, D, E = 2, 8, 32, 16        # batch, seq, width, projection dim
    n_heads, n_layers = 4, 2

    root = jax.random.PRNGKey(0)
    k_p, k_x, k_t = jax.random.split(root, 3)
    params = init_params(k_p, L, D, E, n_layers)

    prompts = jax.random.normal(k_x, (N, L, D), jnp.float32)
    tokenized_prompts = jax.random.randint(k_t, (N, L), 0, 1000, jnp.int32)

    out = text_encoder_forward(params, prompts, tokenized_prompts, n_heads)
    out = jax.block_until_ready(out)

    ref = reference_forward(params, prompts, tokenized_prompts, n_heads)
    np.testing.assert_allclose(np.asarray(out), np.asarray(ref),
                               rtol=1e-4, atol=1e-4)

    assert out.shape == (N, E)
    print("KERNEL_OK")
</pallas_src>

<mosaic_0001>
module attributes {stable_mosaic.version = 11 : i64} {
  func.func @_ln_matmul_kernel(%arg0: i32, %arg1: i32, %arg2: i32, %arg3: memref<16x32xf32, #tpu.memory_space<vmem>>, %arg4: memref<1x32xf32, #tpu.memory_space<vmem>>, %arg5: memref<1x32xf32, #tpu.memory_space<vmem>>, %arg6: memref<1x32x32xf32, #tpu.memory_space<vmem>>, %arg7: memref<1x1x32xf32, #tpu.memory_space<vmem>>, %arg8: memref<1x16x32xf32, #tpu.memory_space<vmem>>, %arg9: memref<16x32xf32, #tpu.memory_space<vmem>>) attributes {dimension_semantics = [#tpu.dimension_semantics<parallel>, #tpu.dimension_semantics<arbitrary>, #tpu.dimension_semantics<arbitrary>], iteration_bounds = array<i64: 1, 3, 1>, scalar_prefetch = 0 : i64, scratch_operands = 1 : i64, tpu.core_type = #tpu.core_type<tc>, window_params = [{transform_indices = @transform_0, window_bounds = array<i64: 16, 32>}, {pipeline_mode = #tpu.pipeline_mode<synchronous>, transform_indices = @transform_1, window_bounds = array<i64: 1, 32>}, {pipeline_mode = #tpu.pipeline_mode<synchronous>, transform_indices = @transform_2, window_bounds = array<i64: 1, 32>}, {transform_indices = @transform_3, window_bounds = array<i64: 1, 32, 32>}, {transform_indices = @transform_4, window_bounds = array<i64: 1, 1, 32>}, {transform_indices = @transform_5, window_bounds = array<i64: 1, 16, 32>}]} {
    %c0_i32 = arith.constant 0 : i32
    %0 = arith.cmpi eq, %arg1, %c0_i32 : i32
    %c0_i32_0 = arith.constant 0 : i32
    %1 = arith.cmpi eq, %arg2, %c0_i32_0 : i32
    %2 = arith.andi %0, %1 : i1
    %3 = arith.extui %2 : i1 to i32
    %c0_i32_1 = arith.constant 0 : i32
    %4 = arith.cmpi ne, %3, %c0_i32_1 : i32
    scf.if %4 {
      %c0_12 = arith.constant 0 : index
      %c0_13 = arith.constant 0 : index
      %16 = vector.load %arg3[%c0_12, %c0_13] : memref<16x32xf32, #tpu.memory_space<vmem>>, vector<16x32xf32>
      %cst_14 = arith.constant dense<0.000000e+00> : vector<16xf32>
      %17 = vector.multi_reduction <add>, %16, %cst_14 [1] : vector<16x32xf32> to vector<16xf32>
      %18 = vector.shape_cast %17 : vector<16xf32> to vector<16x1xf32>
      %cst_15 = arith.constant 3.200000e+01 : f32
      %19 = vector.broadcast %cst_15 : f32 to vector<16x1xf32>
      %20 = arith.divf %18, %19 : vector<16x1xf32>
      %21 = vector.broadcast %20 : vector<16x1xf32> to vector<16x32xf32>
      %22 = arith.subf %16, %21 : vector<16x32xf32>
      %23 = arith.mulf %22, %22 : vector<16x32xf32>
      %cst_16 = arith.constant dense<0.000000e+00> : vector<16xf32>
      %24 = vector.multi_reduction <add>, %23, %cst_16 [1] : vector<16x32xf32> to vector<16xf32>
      %25 = vector.shape_cast %24 : vector<16xf32> to vector<16x1xf32>
      %cst_17 = arith.constant 3.200000e+01 : f32
      %26 = vector.broadcast %cst_17 : f32 to vector<16x1xf32>
      %27 = arith.divf %25, %26 : vector<16x1xf32>
      %cst_18 = arith.constant 9.99999974E-6 : f32
      %28 = vector.broadcast %cst_18 : f32 to vector<16x1xf32>
      %29 = arith.addf %27, %28 : vector<16x1xf32>
      %30 = math.rsqrt %29 : vector<16x1xf32>
      %31 = vector.broadcast %30 : vector<16x1xf32> to vector<16x32xf32>
      %32 = arith.mulf %22, %31 : vector<16x32xf32>
      %c0_19 = arith.constant 0 : index
      %c0_20 = arith.constant 0 : index
      %33 = vector.load %arg4[%c0_19, %c0_20] : memref<1x32xf32, #tpu.memory_space<vmem>>, vector<1x32xf32>
      %34 = vector.broadcast %33 : vector<1x32xf32> to vector<16x32xf32>
      %35 = arith.mulf %32, %34 : vector<16x32xf32>
      %c0_21 = arith.constant 0 : index
      %c0_22 = arith.constant 0 : index
      %36 = vector.load %arg5[%c0_21, %c0_22] : memref<1x32xf32, #tpu.memory_space<vmem>>, vector<1x32xf32>
      %37 = vector.broadcast %36 : vector<1x32xf32> to vector<16x32xf32>
      %38 = arith.addf %35, %37 : vector<16x32xf32>
      %c0_23 = arith.constant 0 : index
      %c0_24 = arith.constant 0 : index
      %39 = vector.load %arg9[%c0_23, %c0_24] : memref<16x32xf32, #tpu.memory_space<vmem>>, vector<16x32xf32>
      tpu.vector_store %arg9[%c0_23, %c0_24], %38 {strides = array<i32>} : memref<16x32xf32, #tpu.memory_space<vmem>>, vector<16x32xf32>,
    } else {
    }
    %c0 = arith.constant 0 : index
    %c0_2 = arith.constant 0 : index
    %5 = vector.load %arg9[%c0, %c0_2] : memref<16x32xf32, #tpu.memory_space<vmem>>, vector<16x32xf32>
    %c0_3 = arith.constant 0 : index
    %c0_4 = arith.constant 0 : index
    %c0_5 = arith.constant 0 : index
    %6 = vector.load %arg6[%c0_3, %c0_4, %c0_5] : memref<1x32x32xf32, #tpu.memory_space<vmem>>, vector<1x32x32xf32>
    %7 = vector.shape_cast %6 : vector<1x32x32xf32> to vector<32x32xf32>
    %cst = arith.constant dense<0.000000e+00> : vector<16x32xf32>
    %8 = tpu.matmul %5, %7, %cst {dimension_numbers = #tpu.dot_dimension_numbers<[1], [0], [0], [1], [0, 0, 1, 1], [], []>} : vector<16x32xf32>, vector<32x32xf32>, vector<16x32xf32> -> vector<16x32xf32>
    %c0_6 = arith.constant 0 : index
    %c0_7 = arith.constant 0 : index
    %c0_8 = arith.constant 0 : index
    %9 = vector.load %arg7[%c0_6, %c0_7, %c0_8] : memref<1x1x32xf32, #tpu.memory_space<vmem>>, vector<1x1x32xf32>
    %10 = vector.shape_cast %9 : vector<1x1x32xf32> to vector<1x32xf32>
    %11 = vector.broadcast %10 : vector<1x32xf32> to vector<16x32xf32>
    %12 = arith.addf %8, %11 : vector<16x32xf32>
    %c0_9 = arith.constant 0 : index
    %c0_10 = arith.constant 0 : index
    %c0_11 = arith.constant 0 : index
    %13 = vector.load %arg8[%c0_9, %c0_10, %c0_11] : memref<1x16x32xf32, #tpu.memory_space<vmem>>, vector<1x16x32xf32>
    %14 = vector.shape_cast %13 : vector<1x16x32xf32> to vector<16x32xf32>
    %15 = vector.shape_cast %12 : vector<16x32xf32> to vector<1x16x32xf32>
    tpu.vector_store %arg8[%c0_9, %c0_10, %c0_11], %15 {strides = array<i32>} : memref<1x16x32xf32, #tpu.memory_space<vmem>>, vector<1x16x32xf32>,
    return
  }
  func.func @transform_0(%arg0: i32, %arg1: i32, %arg2: i32) -> (i32, i32) {
    %c0_i32 = arith.constant 0 : i32
    %c0_i32_0 = arith.constant 0 : i32
    return %arg0, %c0_i32 : i32, i32
  }
  func.func @transform_1(%arg0: i32, %arg1: i32, %arg2: i32) -> (i32, i32) {
    %c0_i32 = arith.constant 0 : i32
    %c0_i32_0 = arith.constant 0 : i32
    %c0_i32_1 = arith.constant 0 : i32
    return %c0_i32, %c0_i32_0 : i32, i32
  }
  func.func @transform_2(%arg0: i32, %arg1: i32, %arg2: i32) -> (i32, i32) {
    %c0_i32 = arith.constant 0 : i32
    %c0_i32_0 = arith.constant 0 : i32
    %c0_i32_1 = arith.constant 0 : i32
    return %c0_i32, %c0_i32_0 : i32, i32
  }
  func.func @transform_3(%arg0: i32, %arg1: i32, %arg2: i32) -> (i32, i32, i32) {
    %c0_i32 = arith.constant 0 : i32
    %c0_i32_0 = arith.constant 0 : i32
    return %arg1, %c0_i32, %arg2 : i32, i32, i32
  }
  func.func @transform_4(%arg0: i32, %arg1: i32, %arg2: i32) -> (i32, i32, i32) {
    %c0_i32 = arith.constant 0 : i32
    %c0_i32_0 = arith.constant 0 : i32
    return %arg1, %c0_i32, %arg2 : i32, i32, i32
  }
  func.func @transform_5(%arg0: i32, %arg1: i32, %arg2: i32) -> (i32, i32, i32) {
    %c0_i32 = arith.constant 0 : i32
    return %arg1, %arg0, %arg2 : i32, i32, i32
  }
}

module attributes {stable_mosaic.version = 11 : i64} {
  func.func @_matmul_res_kernel(%arg0: i32, %arg1: i32, %arg2: i32, %arg3: memref<16x32xf32, #tpu.memory_space<vmem>>, %arg4: memref<32x32xf32, #tpu.memory_space<vmem>>, %arg5: memref<1x32xf32, #tpu.memory_space<vmem>>, %arg6: memref<16x32xf32, #tpu.memory_space<vmem>>, %arg7: memref<16x32xf32, #tpu.memory_space<vmem>>, %arg8: memref<16x32xf32, #tpu.memory_space<vmem>>) attributes {dimension_semantics = [#tpu.dimension_semantics<parallel>, #tpu.dimension_semantics<parallel>, #tpu.dimension_semantics<arbitrary>], iteration_bounds = array<i64: 1, 1, 1>, scalar_prefetch = 0 : i64, scratch_operands = 1 : i64, tpu.core_type = #tpu.core_type<tc>, window_params = [{transform_indices = @transform_0, window_bounds = array<i64: 16, 32>}, {transform_indices = @transform_1, window_bounds = array<i64: 32, 32>}, {transform_indices = @transform_2, window_bounds = array<i64: 1, 32>}, {transform_indices = @transform_3, window_bounds = array<i64: 16, 32>}, {transform_indices = @transform_4, window_bounds = array<i64: 16, 32>}]} {
    %c0_i32 = arith.constant 0 : i32
    %0 = arith.cmpi eq, %arg2, %c0_i32 : i32
    %1 = arith.extui %0 : i1 to i32
    %c0_i32_0 = arith.constant 0 : i32
    %2 = arith.cmpi ne, %1, %c0_i32_0 : i32
    scf.if %2 {
      %cst_10 = arith.constant 0.000000e+00 : f32
      %12 = vector.broadcast %cst_10 : f32 to vector<16x32xf32>
      %c0_11 = arith.constant 0 : index
      %c0_12 = arith.constant 0 : index
      %13 = vector.load %arg8[%c0_11, %c0_12] : memref<16x32xf32, #tpu.memory_space<vmem>>, vector<16x32xf32>
      tpu.vector_store %arg8[%c0_11, %c0_12], %12 {strides = array<i32>} : memref<16x32xf32, #tpu.memory_space<vmem>>, vector<16x32xf32>,
    } else {
    }
    %c0 = arith.constant 0 : index
    %c0_1 = arith.constant 0 : index
    %3 = vector.load %arg8[%c0, %c0_1] : memref<16x32xf32, #tpu.memory_space<vmem>>, vector<16x32xf32>
    %c0_2 = arith.constant 0 : index
    %c0_3 = arith.constant 0 : index
    %4 = vector.load %arg3[%c0_2, %c0_3] : memref<16x32xf32, #tpu.memory_space<vmem>>, vector<16x32xf32>
    %c0_4 = arith.constant 0 : index
    %c0_5 = arith.constant 0 : index
    %5 = vector.load %arg4[%c0_4, %c0_5] : memref<32x32xf32, #tpu.memory_space<vmem>>, vector<32x32xf32>
    %cst = arith.constant dense<0.000000e+00> : vector<16x32xf32>
    %6 = tpu.matmul %4, %5, %cst {dimension_numbers = #tpu.dot_dimension_numbers<[1], [0], [0], [1], [0, 0, 1, 1], [], []>} : vector<16x32xf32>, vector<32x32xf32>, vector<16x32xf32> -> vector<16x32xf32>
    %7 = arith.addf %3, %6 : vector<16x32xf32>
    %c0_6 = arith.constant 0 : index
    %c0_7 = arith.constant 0 : index
    %8 = vector.load %arg8[%c0_6, %c0_7] : memref<16x32xf32, #tpu.memory_space<vmem>>, vector<16x32xf32>
    tpu.vector_store %arg8[%c0_6, %c0_7], %7 {strides = array<i32>} : memref<16x32xf32, #tpu.memory_space<vmem>>, vector<16x32xf32>,
    %c0_i32_8 = arith.constant 0 : i32
    %9 = arith.cmpi eq, %arg2, %c0_i32_8 : i32
    %10 = arith.extui %9 : i1 to i32
    %c0_i32_9 = arith.constant 0 : i32
    %11 = arith.cmpi ne, %10, %c0_i32_9 : i32
    scf.if %11 {
      %c0_10 = arith.constant 0 : index
      %c0_11 = arith.constant 0 : index
      %12 = vector.load %arg8[%c0_10, %c0_11] : memref<16x32xf32, #tpu.memory_space<vmem>>, vector<16x32xf32>
      %c0_12 = arith.constant 0 : index
      %c0_13 = arith.constant 0 : index
      %13 = vector.load %arg5[%c0_12, %c0_13] : memref<1x32xf32, #tpu.memory_space<vmem>>, vector<1x32xf32>
      %14 = vector.broadcast %13 : vector<1x32xf32> to vector<16x32xf32>
      %15 = arith.addf %12, %14 : vector<16x32xf32>
      %c0_14 = arith.constant 0 : index
      %c0_15 = arith.constant 0 : index
      %16 = vector.load %arg6[%c0_14, %c0_15] : memref<16x32xf32, #tpu.memory_space<vmem>>, vector<16x32xf32>
      %17 = arith.addf %15, %16 : vector<16x32xf32>
      %c0_16 = arith.constant 0 : index
      %c0_17 = arith.constant 0 : index
      %18 = vector.load %arg7[%c0_16, %c0_17] : memref<16x32xf32, #tpu.memory_space<vmem>>, vector<16x32xf32>
      tpu.vector_store %arg7[%c0_16, %c0_17], %17 {strides = array<i32>} : memref<16x32xf32, #tpu.memory_space<vmem>>, vector<16x32xf32>,
    } else {
    }
    return
  }
  func.func @transform_0(%arg0: i32, %arg1: i32, %arg2: i32) -> (i32, i32) {
    %c0_i32 = arith.constant 0 : i32
    return %arg0, %arg2 : i32, i32
  }
  func.func @transform_1(%arg0: i32, %arg1: i32, %arg2: i32) -> (i32, i32) {
    %c0_i32 = arith.constant 0 : i32
    return %arg2, %arg1 : i32, i32
  }
  func.func @transform_2(%arg0: i32, %arg1: i32, %arg2: i32) -> (i32, i32) {
    %c0_i32 = arith.constant 0 : i32
    %c0_i32_0 = arith.constant 0 : i32
    return %c0_i32, %arg1 : i32, i32
  }
  func.func @transform_3(%arg0: i32, %arg1: i32, %arg2: i32) -> (i32, i32) {
    %c0_i32 = arith.constant 0 : i32
    return %arg0, %arg1 : i32, i32
  }
  func.func @transform_4(%arg0: i32, %arg1: i32, %arg2: i32) -> (i32, i32) {
    %c0_i32 = arith.constant 0 : i32
    return %arg0, %arg1 : i32, i32
  }
}

module attributes {stable_mosaic.version = 11 : i64} {
  func.func @_attn_kernel(%arg0: i32, %arg1: i32, %arg2: memref<3x1x8x32xf32, #tpu.memory_space<vmem>>, %arg3: memref<1x8x32xf32, #tpu.memory_space<vmem>>) attributes {dimension_semantics = [#tpu.dimension_semantics<parallel>, #tpu.dimension_semantics<parallel>], iteration_bounds = array<i64: 2, 1>, scalar_prefetch = 0 : i64, scratch_operands = 0 : i64, tpu.core_type = #tpu.core_type<tc>, window_params = [{transform_indices = @transform_0, window_bounds = array<i64: 3, 1, 8, 32>}, {transform_indices = @transform_1, window_bounds = array<i64: 1, 8, 32>}]} {
    %c0 = arith.constant 0 : index
    %c0_0 = arith.constant 0 : index
    %c0_1 = arith.constant 0 : index
    %c0_2 = arith.constant 0 : index
    %0 = vector.load %arg2[%c0, %c0_0, %c0_1, %c0_2] : memref<3x1x8x32xf32, #tpu.memory_space<vmem>>, vector<1x1x8x32xf32>
    %1 = vector.shape_cast %0 : vector<1x1x8x32xf32> to vector<8x32xf32>
    %cst = arith.constant 0.353553385 : f32
    %2 = vector.broadcast %cst : f32 to vector<8x32xf32>
    %3 = arith.mulf %1, %2 : vector<8x32xf32>
    %c1 = arith.constant 1 : index
    %c0_3 = arith.constant 0 : index
    %c0_4 = arith.constant 0 : index
    %c0_5 = arith.constant 0 : index
    %4 = vector.load %arg2[%c1, %c0_3, %c0_4, %c0_5] : memref<3x1x8x32xf32, #tpu.memory_space<vmem>>, vector<1x1x8x32xf32>
    %5 = vector.shape_cast %4 : vector<1x1x8x32xf32> to vector<8x32xf32>
    %c2 = arith.constant 2 : index
    %c0_6 = arith.constant 0 : index
    %c0_7 = arith.constant 0 : index
    %c0_8 = arith.constant 0 : index
    %6 = vector.load %arg2[%c2, %c0_6, %c0_7, %c0_8] : memref<3x1x8x32xf32, #tpu.memory_space<vmem>>, vector<1x1x8x32xf32>
    %7 = vector.shape_cast %6 : vector<1x1x8x32xf32> to vector<8x32xf32>
    %8 = tpu.iota {dimensions = array<i32: 0>} : vector<8x8xi32>
    %9 = tpu.iota {dimensions = array<i32: 1>} : vector<8x8xi32>
    %10 = arith.cmpi sle, %9, %8 : vector<8x8xi32>
    %11 = vector.extract_strided_slice %3 {offsets = [0, 0], sizes = [8, 8], strides = [1, 1]} : vector<8x32xf32> to vector<8x8xf32>
    %12 = vector.extract_strided_slice %5 {offsets = [0, 0], sizes = [8, 8], strides = [1, 1]} : vector<8x32xf32> to vector<8x8xf32>
    %cst_9 = arith.constant dense<0.000000e+00> : vector<8x8xf32>
    %13 = tpu.matmul %11, %12, %cst_9 {dimension_numbers = #tpu.dot_dimension_numbers<[1], [1], [0], [0], [0, 0, 1, 0], [], []>} : vector<8x8xf32>, vector<8x8xf32>, vector<8x8xf32> -> vector<8x8xf32>
    %cst_10 = arith.constant 0xFF800000 : f32
    %14 = vector.broadcast %cst_10 : f32 to vector<8x8xf32>
    %15 = arith.select %10, %13, %14 : vector<8x8xi1>, vector<8x8xf32>
    %cst_11 = arith.constant dense<0xFF800000> : vector<8xf32>
    %16 = vector.multi_reduction <maximumf>, %15, %cst_11 [1] : vector<8x8xf32> to vector<8xf32>
    %17 = vector.shape_cast %16 : vector<8xf32> to vector<8x1xf32>
    %18 = vector.broadcast %17 : vector<8x1xf32> to vector<8x8xf32>
    %19 = arith.subf %15, %18 : vector<8x8xf32>
    %20 = math.exp %19 : vector<8x8xf32>
    %cst_12 = arith.constant dense<0.000000e+00> : vector<8xf32>
    %21 = vector.multi_reduction <add>, %20, %cst_12 [1] : vector<8x8xf32> to vector<8xf32>
    %22 = vector.shape_cast %21 : vector<8xf32> to vector<8x1xf32>
    %23 = vector.extract_strided_slice %7 {offsets = [0, 0], sizes = [8, 8], strides = [1, 1]} : vector<8x32xf32> to vector<8x8xf32>
    %cst_13 = arith.constant dense<0.000000e+00> : vector<8x8xf32>
    %24 = tpu.matmul %20, %23, %cst_13 {dimension_numbers = #tpu.dot_dimension_numbers<[1], [0], [0], [1], [0, 0, 1, 1], [], []>} : vector<8x8xf32>, vector<8x8xf32>, vector<8x8xf32> -> vector<8x8xf32>
    %25 = tpu.reciprocal %22 : vector<8x1xf32> -> vector<8x1xf32>
    %26 = vector.broadcast %25 : vector<8x1xf32> to vector<8x8xf32>
    %27 = arith.mulf %24, %26 : vector<8x8xf32>
    %28 = vector.extract_strided_slice %3 {offsets = [0, 8], sizes = [8, 8], strides = [1, 1]} : vector<8x32xf32> to vector<8x8xf32>
    %29 = vector.extract_strided_slice %5 {offsets = [0, 8], sizes = [8, 8], strides = [1, 1]} : vector<8x32xf32> to vector<8x8xf32>
    %cst_14 = arith.constant dense<0.000000e+00> : vector<8x8xf32>
    %30 = tpu.matmul %28, %29, %cst_14 {dimension_numbers = #tpu.dot_dimension_numbers<[1], [1], [0], [0], [0, 0, 1, 0], [], []>} : vector<8x8xf32>, vector<8x8xf32>, vector<8x8xf32> -> vector<8x8xf32>
    %cst_15 = arith.constant 0xFF800000 : f32
    %31 = vector.broadcast %cst_15 : f32 to vector<8x8xf32>
    %32 = arith.select %10, %30, %31 : vector<8x8xi1>, vector<8x8xf32>
    %cst_16 = arith.constant dense<0xFF800000> : vector<8xf32>
    %33 = vector.multi_reduction <maximumf>, %32, %cst_16 [1] : vector<8x8xf32> to vector<8xf32>
    %34 = vector.shape_cast %33 : vector<8xf32> to vector<8x1xf32>
    %35 = vector.broadcast %34 : vector<8x1xf32> to vector<8x8xf32>
    %36 = arith.subf %32, %35 : vector<8x8xf32>
    %37 = math.exp %36 : vector<8x8xf32>
    %cst_17 = arith.constant dense<0.000000e+00> : vector<8xf32>
    %38 = vector.multi_reduction <add>, %37, %cst_17 [1] : vector<8x8xf32> to vector<8xf32>
    %39 = vector.shape_cast %38 : vector<8xf32> to vector<8x1xf32>
    %40 = vector.extract_strided_slice %7 {offsets = [0, 8], sizes = [8, 8], strides = [1, 1]} : vector<8x32xf32> to vector<8x8xf32>
    %cst_18 = arith.constant dense<0.000000e+00> : vector<8x8xf32>
    %41 = tpu.matmul %37, %40, %cst_18 {dimension_numbers = #tpu.dot_dimension_numbers<[1], [0], [0], [1], [0, 0, 1, 1], [], []>} : vector<8x8xf32>, vector<8x8xf32>, vector<8x8xf32> -> vector<8x8xf32>
    %42 = tpu.reciprocal %39 : vector<8x1xf32> -> vector<8x1xf32>
    %43 = vector.broadcast %42 : vector<8x1xf32> to vector<8x8xf32>
    %44 = arith.mulf %41, %43 : vector<8x8xf32>
    %45 = vector.extract_strided_slice %3 {offsets = [0, 16], sizes = [8, 8], strides = [1, 1]} : vector<8x32xf32> to vector<8x8xf32>
    %46 = vector.extract_strided_slice %5 {offsets = [0, 16], sizes = [8, 8], strides = [1, 1]} : vector<8x32xf32> to vector<8x8xf32>
    %cst_19 = arith.constant dense<0.000000e+00> : vector<8x8xf32>
    %47 = tpu.matmul %45, %46, %cst_19 {dimension_numbers = #tpu.dot_dimension_numbers<[1], [1], [0], [0], [0, 0, 1, 0], [], []>} : vector<8x8xf32>, vector<8x8xf32>, vector<8x8xf32> -> vector<8x8xf32>
    %cst_20 = arith.constant 0xFF800000 : f32
    %48 = vector.broadcast %cst_20 : f32 to vector<8x8xf32>
    %49 = arith.select %10, %47, %48 : vector<8x8xi1>, vector<8x8xf32>
    %cst_21 = arith.constant dense<0xFF800000> : vector<8xf32>
    %50 = vector.multi_reduction <maximumf>, %49, %cst_21 [1] : vector<8x8xf32> to vector<8xf32>
    %51 = vector.shape_cast %50 : vector<8xf32> to vector<8x1xf32>
    %52 = vector.broadcast %51 : vector<8x1xf32> to vector<8x8xf32>
    %53 = arith.subf %49, %52 : vector<8x8xf32>
    %54 = math.exp %53 : vector<8x8xf32>
    %cst_22 = arith.constant dense<0.000000e+00> : vector<8xf32>
    %55 = vector.multi_reduction <add>, %54, %cst_22 [1] : vector<8x8xf32> to vector<8xf32>
    %56 = vector.shape_cast %55 : vector<8xf32> to vector<8x1xf32>
    %57 = vector.extract_strided_slice %7 {offsets = [0, 16], sizes = [8, 8], strides = [1, 1]} : vector<8x32xf32> to vector<8x8xf32>
    %cst_23 = arith.constant dense<0.000000e+00> : vector<8x8xf32>
    %58 = tpu.matmul %54, %57, %cst_23 {dimension_numbers = #tpu.dot_dimension_numbers<[1], [0], [0], [1], [0, 0, 1, 1], [], []>} : vector<8x8xf32>, vector<8x8xf32>, vector<8x8xf32> -> vector<8x8xf32>
    %59 = tpu.reciprocal %56 : vector<8x1xf32> -> vector<8x1xf32>
    %60 = vector.broadcast %59 : vector<8x1xf32> to vector<8x8xf32>
    %61 = arith.mulf %58, %60 : vector<8x8xf32>
    %62 = vector.extract_strided_slice %3 {offsets = [0, 24], sizes = [8, 8], strides = [1, 1]} : vector<8x32xf32> to vector<8x8xf32>
    %63 = vector.extract_strided_slice %5 {offsets = [0, 24], sizes = [8, 8], strides = [1, 1]} : vector<8x32xf32> to vector<8x8xf32>
    %cst_24 = arith.constant dense<0.000000e+00> : vector<8x8xf32>
    %64 = tpu.matmul %62, %63, %cst_24 {dimension_numbers = #tpu.dot_dimension_numbers<[1], [1], [0], [0], [0, 0, 1, 0], [], []>} : vector<8x8xf32>, vector<8x8xf32>, vector<8x8xf32> -> vector<8x8xf32>
    %cst_25 = arith.constant 0xFF800000 : f32
    %65 = vector.broadcast %cst_25 : f32 to vector<8x8xf32>
    %66 = arith.select %10, %64, %65 : vector<8x8xi1>, vector<8x8xf32>
    %cst_26 = arith.constant dense<0xFF800000> : vector<8xf32>
    %67 = vector.multi_reduction <maximumf>, %66, %cst_26 [1] : vector<8x8xf32> to vector<8xf32>
    %68 = vector.shape_cast %67 : vector<8xf32> to vector<8x1xf32>
    %69 = vector.broadcast %68 : vector<8x1xf32> to vector<8x8xf32>
    %70 = arith.subf %66, %69 : vector<8x8xf32>
    %71 = math.exp %70 : vector<8x8xf32>
    %cst_27 = arith.constant dense<0.000000e+00> : vector<8xf32>
    %72 = vector.multi_reduction <add>, %71, %cst_27 [1] : vector<8x8xf32> to vector<8xf32>
    %73 = vector.shape_cast %72 : vector<8xf32> to vector<8x1xf32>
    %74 = vector.extract_strided_slice %7 {offsets = [0, 24], sizes = [8, 8], strides = [1, 1]} : vector<8x32xf32> to vector<8x8xf32>
    %cst_28 = arith.constant dense<0.000000e+00> : vector<8x8xf32>
    %75 = tpu.matmul %71, %74, %cst_28 {dimension_numbers = #tpu.dot_dimension_numbers<[1], [0], [0], [1], [0, 0, 1, 1], [], []>} : vector<8x8xf32>, vector<8x8xf32>, vector<8x8xf32> -> vector<8x8xf32>
    %76 = tpu.reciprocal %73 : vector<8x1xf32> -> vector<8x1xf32>
    %77 = vector.broadcast %76 : vector<8x1xf32> to vector<8x8xf32>
    %78 = arith.mulf %75, %77 : vector<8x8xf32>
    %79 = tpu.concatenate %27, %44, %61, %78 in 1 : vector<8x8xf32>, vector<8x8xf32>, vector<8x8xf32>, vector<8x8xf32> -> vector<8x32xf32>
    %c0_29 = arith.constant 0 : index
    %c0_30 = arith.constant 0 : index
    %c0_31 = arith.constant 0 : index
    %80 = vector.load %arg3[%c0_29, %c0_30, %c0_31] : memref<1x8x32xf32, #tpu.memory_space<vmem>>, vector<1x8x32xf32>
    %81 = vector.shape_cast %80 : vector<1x8x32xf32> to vector<8x32xf32>
    %82 = vector.shape_cast %79 : vector<8x32xf32> to vector<1x8x32xf32>
    tpu.vector_store %arg3[%c0_29, %c0_30, %c0_31], %82 {strides = array<i32>} : memref<1x8x32xf32, #tpu.memory_space<vmem>>, vector<1x8x32xf32>,
    return
  }
  func.func @transform_0(%arg0: i32, %arg1: i32) -> (i32, i32, i32, i32) {
    %c0_i32 = arith.constant 0 : i32
    %c0_i32_0 = arith.constant 0 : i32
    %c0_i32_1 = arith.constant 0 : i32
    return %c0_i32, %arg0, %c0_i32_0, %arg1 : i32, i32, i32, i32
  }
  func.func @transform_1(%arg0: i32, %arg1: i32) -> (i32, i32, i32) {
    %c0_i32 = arith.constant 0 : i32
    %c0_i32_0 = arith.constant 0 : i32
    return %arg0, %c0_i32, %arg1 : i32, i32, i32
  }
}

module attributes {stable_mosaic.version = 11 : i64} {
  func.func @_ln_matmul_kernel(%arg0: i32, %arg1: i32, %arg2: i32, %arg3: memref<16x32xf32, #tpu.memory_space<vmem>>, %arg4: memref<1x32xf32, #tpu.memory_space<vmem>>, %arg5: memref<1x32xf32, #tpu.memory_space<vmem>>, %arg6: memref<1x32x128xf32, #tpu.memory_space<vmem>>, %arg7: memref<1x1x128xf32, #tpu.memory_space<vmem>>, %arg8: memref<1x16x128xf32, #tpu.memory_space<vmem>>, %arg9: memref<16x32xf32, #tpu.memory_space<vmem>>) attributes {dimension_semantics = [#tpu.dimension_semantics<parallel>, #tpu.dimension_semantics<arbitrary>, #tpu.dimension_semantics<arbitrary>], iteration_bounds = array<i64: 1, 1, 1>, scalar_prefetch = 0 : i64, scratch_operands = 1 : i64, tpu.core_type = #tpu.core_type<tc>, window_params = [{transform_indices = @transform_0, window_bounds = array<i64: 16, 32>}, {pipeline_mode = #tpu.pipeline_mode<synchronous>, transform_indices = @transform_1, window_bounds = array<i64: 1, 32>}, {pipeline_mode = #tpu.pipeline_mode<synchronous>, transform_indices = @transform_2, window_bounds = array<i64: 1, 32>}, {transform_indices = @transform_3, window_bounds = array<i64: 1, 32, 128>}, {transform_indices = @transform_4, window_bounds = array<i64: 1, 1, 128>}, {transform_indices = @transform_5, window_bounds = array<i64: 1, 16, 128>}]} {
    %c0_i32 = arith.constant 0 : i32
    %0 = arith.cmpi eq, %arg1, %c0_i32 : i32
    %c0_i32_0 = arith.constant 0 : i32
    %1 = arith.cmpi eq, %arg2, %c0_i32_0 : i32
    %2 = arith.andi %0, %1 : i1
    %3 = arith.extui %2 : i1 to i32
    %c0_i32_1 = arith.constant 0 : i32
    %4 = arith.cmpi ne, %3, %c0_i32_1 : i32
    scf.if %4 {
      %c0_14 = arith.constant 0 : index
      %c0_15 = arith.constant 0 : index
      %24 = vector.load %arg3[%c0_14, %c0_15] : memref<16x32xf32, #tpu.memory_space<vmem>>, vector<16x32xf32>
      %cst_16 = arith.constant dense<0.000000e+00> : vector<16xf32>
      %25 = vector.multi_reduction <add>, %24, %cst_16 [1] : vector<16x32xf32> to vector<16xf32>
      %26 = vector.shape_cast %25 : vector<16xf32> to vector<16x1xf32>
      %cst_17 = arith.constant 3.200000e+01 : f32
      %27 = vector.broadcast %cst_17 : f32 to vector<16x1xf32>
      %28 = arith.divf %26, %27 : vector<16x1xf32>
      %29 = vector.broadcast %28 : vector<16x1xf32> to vector<16x32xf32>
      %30 = arith.subf %24, %29 : vector<16x32xf32>
      %31 = arith.mulf %30, %30 : vector<16x32xf32>
      %cst_18 = arith.constant dense<0.000000e+00> : vector<16xf32>
      %32 = vector.multi_reduction <add>, %31, %cst_18 [1] : vector<16x32xf32> to vector<16xf32>
      %33 = vector.shape_cast %32 : vector<16xf32> to vector<16x1xf32>
      %cst_19 = arith.constant 3.200000e+01 : f32
      %34 = vector.broadcast %cst_19 : f32 to vector<16x1xf32>
      %35 = arith.divf %33, %34 : vector<16x1xf32>
      %cst_20 = arith.constant 9.99999974E-6 : f32
      %36 = vector.broadcast %cst_20 : f32 to vector<16x1xf32>
      %37 = arith.addf %35, %36 : vector<16x1xf32>
      %38 = math.rsqrt %37 : vector<16x1xf32>
      %39 = vector.broadcast %38 : vector<16x1xf32> to vector<16x32xf32>
      %40 = arith.mulf %30, %39 : vector<16x32xf32>
      %c0_21 = arith.constant 0 : index
      %c0_22 = arith.constant 0 : index
      %41 = vector.load %arg4[%c0_21, %c0_22] : memref<1x32xf32, #tpu.memory_space<vmem>>, vector<1x32xf32>
      %42 = vector.broadcast %41 : vector<1x32xf32> to vector<16x32xf32>
      %43 = arith.mulf %40, %42 : vector<16x32xf32>
      %c0_23 = arith.constant 0 : index
      %c0_24 = arith.constant 0 : index
      %44 = vector.load %arg5[%c0_23, %c0_24] : memref<1x32xf32, #tpu.memory_space<vmem>>, vector<1x32xf32>
      %45 = vector.broadcast %44 : vector<1x32xf32> to vector<16x32xf32>
      %46 = arith.addf %43, %45 : vector<16x32xf32>
      %c0_25 = arith.constant 0 : index
      %c0_26 = arith.constant 0 : index
      %47 = vector.load %arg9[%c0_25, %c0_26] : memref<16x32xf32, #tpu.memory_space<vmem>>, vector<16x32xf32>
      tpu.vector_store %arg9[%c0_25, %c0_26], %46 {strides = array<i32>} : memref<16x32xf32, #tpu.memory_space<vmem>>, vector<16x32xf32>,
    } else {
    }
    %c0 = arith.constant 0 : index
    %c0_2 = arith.constant 0 : index
    %5 = vector.load %arg9[%c0, %c0_2] : memref<16x32xf32, #tpu.memory_space<vmem>>, vector<16x32xf32>
    %c0_3 = arith.constant 0 : index
    %c0_4 = arith.constant 0 : index
    %c0_5 = arith.constant 0 : index
    %6 = vector.load %arg6[%c0_3, %c0_4, %c0_5] : memref<1x32x128xf32, #tpu.memory_space<vmem>>, vector<1x32x128xf32>
    %7 = vector.shape_cast %6 : vector<1x32x128xf32> to vector<32x128xf32>
    %cst = arith.constant dense<0.000000e+00> : vector<16x128xf32>
    %8 = tpu.matmul %5, %7, %cst {dimension_numbers = #tpu.dot_dimension_numbers<[1], [0], [0], [1], [0, 0, 1, 1], [], []>} : vector<16x32xf32>, vector<32x128xf32>, vector<16x128xf32> -> vector<16x128xf32>
    %c0_6 = arith.constant 0 : index
    %c0_7 = arith.constant 0 : index
    %c0_8 = arith.constant 0 : index
    %9 = vector.load %arg7[%c0_6, %c0_7, %c0_8] : memref<1x1x128xf32, #tpu.memory_space<vmem>>, vector<1x1x128xf32>
    %10 = vector.shape_cast %9 : vector<1x1x128xf32> to vector<1x128xf32>
    %11 = vector.broadcast %10 : vector<1x128xf32> to vector<16x128xf32>
    %12 = arith.addf %8, %11 : vector<16x128xf32>
    %cst_9 = arith.constant 1.702000e+00 : f32
    %13 = vector.broadcast %cst_9 : f32 to vector<16x128xf32>
    %14 = arith.mulf %13, %12 : vector<16x128xf32>
    %15 = arith.negf %14 : vector<16x128xf32>
    %16 = math.exp %15 : vector<16x128xf32>
    %cst_10 = arith.constant 1.000000e+00 : f32
    %17 = vector.broadcast %cst_10 : f32 to vector<16x128xf32>
    %18 = arith.addf %17, %16 : vector<16x128xf32>
    %19 = arith.divf %17, %18 : vector<16x128xf32>
    %20 = arith.mulf %12, %19 : vector<16x128xf32>
    %c0_11 = arith.constant 0 : index
    %c0_12 = arith.constant 0 : index
    %c0_13 = arith.constant 0 : index
    %21 = vector.load %arg8[%c0_11, %c0_12, %c0_13] : memref<1x16x128xf32, #tpu.memory_space<vmem>>, vector<1x16x128xf32>
    %22 = vector.shape_cast %21 : vector<1x16x128xf32> to vector<16x128xf32>
    %23 = vector.shape_cast %20 : vector<16x128xf32> to vector<1x16x128xf32>
    tpu.vector_store %arg8[%c0_11, %c0_12, %c0_13], %23 {strides = array<i32>} : memref<1x16x128xf32, #tpu.memory_space<vmem>>, vector<1x16x128xf32>,
    return
  }
  func.func @transform_0(%arg0: i32, %arg1: i32, %arg2: i32) -> (i32, i32) {
    %c0_i32 = arith.constant 0 : i32
    %c0_i32_0 = arith.constant 0 : i32
    return %arg0, %c0_i32 : i32, i32
  }
  func.func @transform_1(%arg0: i32, %arg1: i32, %arg2: i32) -> (i32, i32) {
    %c0_i32 = arith.constant 0 : i32
    %c0_i32_0 = arith.constant 0 : i32
    %c0_i32_1 = arith.constant 0 : i32
    return %c0_i32, %c0_i32_0 : i32, i32
  }
  func.func @transform_2(%arg0: i32, %arg1: i32, %arg2: i32) -> (i32, i32) {
    %c0_i32 = arith.constant 0 : i32
    %c0_i32_0 = arith.constant 0 : i32
    %c0_i32_1 = arith.constant 0 : i32
    return %c0_i32, %c0_i32_0 : i32, i32
  }
  func.func @transform_3(%arg0: i32, %arg1: i32, %arg2: i32) -> (i32, i32, i32) {
    %c0_i32 = arith.constant 0 : i32
    %c0_i32_0 = arith.constant 0 : i32
    return %arg1, %c0_i32, %arg2 : i32, i32, i32
  }
  func.func @transform_4(%arg0: i32, %arg1: i32, %arg2: i32) -> (i32, i32, i32) {
    %c0_i32 = arith.constant 0 : i32
    %c0_i32_0 = arith.constant 0 : i32
    return %arg1, %c0_i32, %arg2 : i32, i32, i32
  }
  func.func @transform_5(%arg0: i32, %arg1: i32, %arg2: i32) -> (i32, i32, i32) {
    %c0_i32 = arith.constant 0 : i32
    return %arg1, %arg0, %arg2 : i32, i32, i32
  }
}

module attributes {stable_mosaic.version = 11 : i64} {
  func.func @_matmul_res_kernel(%arg0: i32, %arg1: i32, %arg2: i32, %arg3: memref<16x128xf32, #tpu.memory_space<vmem>>, %arg4: memref<128x32xf32, #tpu.memory_space<vmem>>, %arg5: memref<1x32xf32, #tpu.memory_space<vmem>>, %arg6: memref<16x32xf32, #tpu.memory_space<vmem>>, %arg7: memref<16x32xf32, #tpu.memory_space<vmem>>, %arg8: memref<16x32xf32, #tpu.memory_space<vmem>>) attributes {dimension_semantics = [#tpu.dimension_semantics<parallel>, #tpu.dimension_semantics<parallel>, #tpu.dimension_semantics<arbitrary>], iteration_bounds = array<i64: 1, 1, 1>, scalar_prefetch = 0 : i64, scratch_operands = 1 : i64, tpu.core_type = #tpu.core_type<tc>, window_params = [{transform_indices = @transform_0, window_bounds = array<i64: 16, 128>}, {transform_indices = @transform_1, window_bounds = array<i64: 128, 32>}, {transform_indices = @transform_2, window_bounds = array<i64: 1, 32>}, {transform_indices = @transform_3, window_bounds = array<i64: 16, 32>}, {transform_indices = @transform_4, window_bounds = array<i64: 16, 32>}]} {
    %c0_i32 = arith.constant 0 : i32
    %0 = arith.cmpi eq, %arg2, %c0_i32 : i32
    %1 = arith.extui %0 : i1 to i32
    %c0_i32_0 = arith.constant 0 : i32
    %2 = arith.cmpi ne, %1, %c0_i32_0 : i32
    scf.if %2 {
      %cst_10 = arith.constant 0.000000e+00 : f32
      %12 = vector.broadcast %cst_10 : f32 to vector<16x32xf32>
      %c0_11 = arith.constant 0 : index
      %c0_12 = arith.constant 0 : index
      %13 = vector.load %arg8[%c0_11, %c0_12] : memref<16x32xf32, #tpu.memory_space<vmem>>, vector<16x32xf32>
      tpu.vector_store %arg8[%c0_11, %c0_12], %12 {strides = array<i32>} : memref<16x32xf32, #tpu.memory_space<vmem>>, vector<16x32xf32>,
    } else {
    }
    %c0 = arith.constant 0 : index
    %c0_1 = arith.constant 0 : index
    %3 = vector.load %arg8[%c0, %c0_1] : memref<16x32xf32, #tpu.memory_space<vmem>>, vector<16x32xf32>
    %c0_2 = arith.constant 0 : index
    %c0_3 = arith.constant 0 : index
    %4 = vector.load %arg3[%c0_2, %c0_3] : memref<16x128xf32, #tpu.memory_space<vmem>>, vector<16x128xf32>
    %c0_4 = arith.constant 0 : index
    %c0_5 = arith.constant 0 : index
    %5 = vector.load %arg4[%c0_4, %c0_5] : memref<128x32xf32, #tpu.memory_space<vmem>>, vector<128x32xf32>
    %cst = arith.constant dense<0.000000e+00> : vector<16x32xf32>
    %6 = tpu.matmul %4, %5, %cst {dimension_numbers = #tpu.dot_dimension_numbers<[1], [0], [0], [1], [0, 0, 1, 1], [], []>} : vector<16x128xf32>, vector<128x32xf32>, vector<16x32xf32> -> vector<16x32xf32>
    %7 = arith.addf %3, %6 : vector<16x32xf32>
    %c0_6 = arith.constant 0 : index
    %c0_7 = arith.constant 0 : index
    %8 = vector.load %arg8[%c0_6, %c0_7] : memref<16x32xf32, #tpu.memory_space<vmem>>, vector<16x32xf32>
    tpu.vector_store %arg8[%c0_6, %c0_7], %7 {strides = array<i32>} : memref<16x32xf32, #tpu.memory_space<vmem>>, vector<16x32xf32>,
    %c0_i32_8 = arith.constant 0 : i32
    %9 = arith.cmpi eq, %arg2, %c0_i32_8 : i32
    %10 = arith.extui %9 : i1 to i32
    %c0_i32_9 = arith.constant 0 : i32
    %11 = arith.cmpi ne, %10, %c0_i32_9 : i32
    scf.if %11 {
      %c0_10 = arith.constant 0 : index
      %c0_11 = arith.constant 0 : index
      %12 = vector.load %arg8[%c0_10, %c0_11] : memref<16x32xf32, #tpu.memory_space<vmem>>, vector<16x32xf32>
      %c0_12 = arith.constant 0 : index
      %c0_13 = arith.constant 0 : index
      %13 = vector.load %arg5[%c0_12, %c0_13] : memref<1x32xf32, #tpu.memory_space<vmem>>, vector<1x32xf32>
      %14 = vector.broadcast %13 : vector<1x32xf32> to vector<16x32xf32>
      %15 = arith.addf %12, %14 : vector<16x32xf32>
      %c0_14 = arith.constant 0 : index
      %c0_15 = arith.constant 0 : index
      %16 = vector.load %arg6[%c0_14, %c0_15] : memref<16x32xf32, #tpu.memory_space<vmem>>, vector<16x32xf32>
      %17 = arith.addf %15, %16 : vector<16x32xf32>
      %c0_16 = arith.constant 0 : index
      %c0_17 = arith.constant 0 : index
      %18 = vector.load %arg7[%c0_16, %c0_17] : memref<16x32xf32, #tpu.memory_space<vmem>>, vector<16x32xf32>
      tpu.vector_store %arg7[%c0_16, %c0_17], %17 {strides = array<i32>} : memref<16x32xf32, #tpu.memory_space<vmem>>, vector<16x32xf32>,
    } else {
    }
    return
  }
  func.func @transform_0(%arg0: i32, %arg1: i32, %arg2: i32) -> (i32, i32) {
    %c0_i32 = arith.constant 0 : i32
    return %arg0, %arg2 : i32, i32
  }
  func.func @transform_1(%arg0: i32, %arg1: i32, %arg2: i32) -> (i32, i32) {
    %c0_i32 = arith.constant 0 : i32
    return %arg2, %arg1 : i32, i32
  }
  func.func @transform_2(%arg0: i32, %arg1: i32, %arg2: i32) -> (i32, i32) {
    %c0_i32 = arith.constant 0 : i32
    %c0_i32_0 = arith.constant 0 : i32
    return %c0_i32, %arg1 : i32, i32
  }
  func.func @transform_3(%arg0: i32, %arg1: i32, %arg2: i32) -> (i32, i32) {
    %c0_i32 = arith.constant 0 : i32
    return %arg0, %arg1 : i32, i32
  }
  func.func @transform_4(%arg0: i32, %arg1: i32, %arg2: i32) -> (i32, i32) {
    %c0_i32 = arith.constant 0 : i32
    return %arg0, %arg1 : i32, i32
  }
}

module attributes {stable_mosaic.version = 11 : i64} {
  func.func @_layernorm_kernel(%arg0: i32, %arg1: memref<16x32xf32, #tpu.memory_space<vmem>>, %arg2: memref<1x32xf32, #tpu.memory_space<vmem>>, %arg3: memref<1x32xf32, #tpu.memory_space<vmem>>, %arg4: memref<16x32xf32, #tpu.memory_space<vmem>>) attributes {dimension_semantics = [#tpu.dimension_semantics<parallel>], iteration_bounds = array<i64: 1>, scalar_prefetch = 0 : i64, scratch_operands = 0 : i64, tpu.core_type = #tpu.core_type<tc>, window_params = [{transform_indices = @transform_0, window_bounds = array<i64: 16, 32>}, {pipeline_mode = #tpu.pipeline_mode<synchronous>, transform_indices = @transform_1, window_bounds = array<i64: 1, 32>}, {pipeline_mode = #tpu.pipeline_mode<synchronous>, transform_indices = @transform_2, window_bounds = array<i64: 1, 32>}, {transform_indices = @transform_3, window_bounds = array<i64: 16, 32>}]} {
    %c0 = arith.constant 0 : index
    %c0_0 = arith.constant 0 : index
    %0 = vector.load %arg1[%c0, %c0_0] : memref<16x32xf32, #tpu.memory_space<vmem>>, vector<16x32xf32>
    %cst = arith.constant dense<0.000000e+00> : vector<16xf32>
    %1 = vector.multi_reduction <add>, %0, %cst [1] : vector<16x32xf32> to vector<16xf32>
    %2 = vector.shape_cast %1 : vector<16xf32> to vector<16x1xf32>
    %cst_1 = arith.constant 3.200000e+01 : f32
    %3 = vector.broadcast %cst_1 : f32 to vector<16x1xf32>
    %4 = arith.divf %2, %3 : vector<16x1xf32>
    %5 = vector.broadcast %4 : vector<16x1xf32> to vector<16x32xf32>
    %6 = arith.subf %0, %5 : vector<16x32xf32>
    %7 = arith.mulf %6, %6 : vector<16x32xf32>
    %cst_2 = arith.constant dense<0.000000e+00> : vector<16xf32>
    %8 = vector.multi_reduction <add>, %7, %cst_2 [1] : vector<16x32xf32> to vector<16xf32>
    %9 = vector.shape_cast %8 : vector<16xf32> to vector<16x1xf32>
    %cst_3 = arith.constant 3.200000e+01 : f32
    %10 = vector.broadcast %cst_3 : f32 to vector<16x1xf32>
    %11 = arith.divf %9, %10 : vector<16x1xf32>
    %cst_4 = arith.constant 9.99999974E-6 : f32
    %12 = vector.broadcast %cst_4 : f32 to vector<16x1xf32>
    %13 = arith.addf %11, %12 : vector<16x1xf32>
    %14 = math.rsqrt %13 : vector<16x1xf32>
    %15 = vector.broadcast %14 : vector<16x1xf32> to vector<16x32xf32>
    %16 = arith.mulf %6, %15 : vector<16x32xf32>
    %c0_5 = arith.constant 0 : index
    %c0_6 = arith.constant 0 : index
    %17 = vector.load %arg2[%c0_5, %c0_6] : memref<1x32xf32, #tpu.memory_space<vmem>>, vector<1x32xf32>
    %18 = vector.broadcast %17 : vector<1x32xf32> to vector<16x32xf32>
    %19 = arith.mulf %16, %18 : vector<16x32xf32>
    %c0_7 = arith.constant 0 : index
    %c0_8 = arith.constant 0 : index
    %20 = vector.load %arg3[%c0_7, %c0_8] : memref<1x32xf32, #tpu.memory_space<vmem>>, vector<1x32xf32>
    %21 = vector.broadcast %20 : vector<1x32xf32> to vector<16x32xf32>
    %22 = arith.addf %19, %21 : vector<16x32xf32>
    %c0_9 = arith.constant 0 : index
    %c0_10 = arith.constant 0 : index
    %23 = vector.load %arg4[%c0_9, %c0_10] : memref<16x32xf32, #tpu.memory_space<vmem>>, vector<16x32xf32>
    tpu.vector_store %arg4[%c0_9, %c0_10], %22 {strides = array<i32>} : memref<16x32xf32, #tpu.memory_space<vmem>>, vector<16x32xf32>,
    return
  }
  func.func @transform_0(%arg0: i32) -> (i32, i32) {
    %c0_i32 = arith.constant 0 : i32
    %c0_i32_0 = arith.constant 0 : i32
    return %arg0, %c0_i32 : i32, i32
  }
  func.func @transform_1(%arg0: i32) -> (i32, i32) {
    %c0_i32 = arith.constant 0 : i32
    %c0_i32_0 = arith.constant 0 : i32
    %c0_i32_1 = arith.constant 0 : i32
    return %c0_i32, %c0_i32_0 : i32, i32
  }
  func.func @transform_2(%arg0: i32) -> (i32, i32) {
    %c0_i32 = arith.constant 0 : i32
    %c0_i32_0 = arith.constant 0 : i32
    %c0_i32_1 = arith.constant 0 : i32
    return %c0_i32, %c0_i32_0 : i32, i32
  }
  func.func @transform_3(%arg0: i32) -> (i32, i32) {
    %c0_i32 = arith.constant 0 : i32
    %c0_i32_0 = arith.constant 0 : i32
    return %arg0, %c0_i32 : i32, i32
  }
}

</mosaic_0001>

<bundles_post_ra>
// kernel: text_encoder_forward.13
= control target key start
LH: loop header
LB: loop body
LE: loop exit
PB: predicated region body
PF: predicated region fallthrough
CT: control target
= control target key end

     0   :  { %vm21_vm0 = vcmask 261120   ;;  %v95_v2 = vmov 0.0   ;;  %s162_s1 = inlined_call_operand.vmem [shape: f32[32,32], index: 1, kind: input, shape index: {}]   ;;  %s163_s2 = inlined_call_operand.vmem [shape: f32[1,32], index: 2, kind: input, shape index: {}]   ;;  %s164_s0 = inlined_call_operand.vmem [shape: f32[16,32], index: 0, kind: input, shape index: {}]   ;;  %s165_s3 = inlined_call_operand.vmem [shape: f32[16,32], index: 3, kind: input, shape index: {}]   ;;  %s166_s4 = inlined_call_operand.vmem [shape: f32[16,32], index: 4, kind: output, shape index: {}]  }
   0x1   :  { %v31_v0 = vld [vmem:[%s162_s1 + $0x18] sm:$0xff]  ;;  %v30_v1 = vld [vmem:[%s162_s1 + $0x10] sm:$0xff]  ;;  %22 = vst.msk [vmem:[#allocation2] sm:$0xff] %vm21_vm0, %v95_v2  ;;  %v29_v3 = vld [vmem:[%s162_s1 + $0x8] sm:$0xff] }
   0x2   :  { %51 = vmatpush.msra.mxu0 %v31_v0  ;;  %89 = vmatpush.msra.mxu1 %v31_v0  ;;  %23 = vst.msk [vmem:[#allocation2 + $0x8] sm:$0xff] %vm21_vm0, %v95_v2  ;;  %v28_v4 = vld [vmem:[%s162_s1] sm:$0xff]  ;;  %v27_v6 = vld [vmem:[%s164_s0 + $0x8] sm:$0xff] }
   0x3   :  { %v26_v5 = vld [vmem:[%s164_s0] sm:$0xff]  ;;  %v78_v18 = vld [vmem:[%s165_s3 + $0x8] sm:$0xff] }
   0x4   :  { %52 = vmatpush.msra.mxu0 %v30_v1  ;;  %90 = vmatpush.msra.mxu1 %v30_v1  ;;  %v94_v13 = vld [vmem:[%s163_s2] ss:$0 sm:$0xff] }
   0x5   :  { %v77_v15 = vld [vmem:[%s165_s3] sm:$0xff] }
   0x6   :  { %53 = vmatpush.msra.mxu0 %v29_v3  ;;  %91 = vmatpush.msra.mxu1 %v29_v3 }
   0x8   :  { %54 = vmatpush.msra.mxu0 %v28_v4  ;;  %92 = vmatpush.msra.mxu1 %v28_v4  ;;  %v24_v7 = vld [vmem:[#allocation2] sm:$0xff] }
   0x9   :  { %87 = vmatmul.msk.f32.vlgmr.msra.gmra.mxu0 %vm21_vm0, %v26_v5  ;;  %88 = vmatmul.msk.f32.vlgmr.msra.gmra.mxu1 %vm21_vm0, %v27_v6  ;;  %v25_v8 = vld [vmem:[#allocation2 + $0x8] sm:$0xff] }
  0x86   :  { %v56_v9 = vpop.f32.mrf.mxu0  ;;  %v59_v10 = vpop.f32.mrf.mxu1 }
  0x87   :  { %v62_v11 = vadd.f32 %v56_v9, %v24_v7  ;;  %v63_v12 = vadd.f32 %v59_v10, %v25_v8 }
  0x89   :  { %64 = vst.msk [vmem:[#allocation2] sm:$0xff] %vm21_vm0, %v62_v11 }
  0x8a   :  { %65 = vst.msk [vmem:[#allocation2 + $0x8] sm:$0xff] %vm21_vm0, %v63_v12 }
  0x90   :  { %v69_v14 = vld [vmem:[#allocation2] sm:$0xff] }
  0x91   :  { %v75_v16 = vadd.f32 %v94_v13, %v69_v14  ;;  %v70_v17 = vld [vmem:[#allocation2 + $0x8] sm:$0xff] }
  0x92   :  { %v76_v19 = vadd.f32 %v94_v13, %v70_v17 }
  0x93   :  { %v79_v20 = vadd.f32 %v77_v15, %v75_v16 }
  0x94   :  { %v80_v21 = vadd.f32 %v78_v18, %v76_v19 }
  0x95   :  { %81 = vst.msk [vmem:[%s166_s4] sm:$0xff] %vm21_vm0, %v79_v20 }
  0x96   :  { %82 = vst.msk [vmem:[%s166_s4 + $0x8] sm:$0xff] %vm21_vm0, %v80_v21 }

// kernel: text_encoder_forward.11
= control target key start
LH: loop header
LB: loop body
LE: loop exit
PB: predicated region body
PF: predicated region fallthrough
CT: control target
= control target key end

     0   :  { %s675_s18 = smov 0   ;;  %s677_s19 = smov 0   ;;  %s749_s0 = inlined_call_operand.vmem [shape: f32[16,32], index: 0, kind: input, shape index: {}]   ;;  %s750_s1 = inlined_call_operand.vmem [shape: f32[1,32], index: 1, kind: input, shape index: {}]   ;;  %s751_s2 = inlined_call_operand.vmem [shape: f32[1,32], index: 2, kind: input, shape index: {}]   ;;  %s752_s3 = inlined_call_operand.vmem [shape: f32[3,32,32], index: 3, kind: input, shape index: {}]   ;;  %s753_s4 = inlined_call_operand.vmem [shape: f32[3,1,32], index: 4, kind: input, shape index: {}]   ;;  %s754_s5 = inlined_call_operand.vmem [shape: f32[3,16,32], index: 5, kind: output, shape index: {}]  }
   0x1   :  { %s679_s20 = smov 0  }
   0x2 LB: > { %s30_s21 = sadd.s32 1, %s638_s19  ;;  %p569_p0 = scmp.ge.s32.totalorder %s642_s20, 1  ;;  %s642_s20 = sphi %s679_s20, %s15_s20   ;;  %s638_s19 = sphi %s677_s19, %s756_s19   ;;  %s634_s18 = sphi %s675_s18, %s755_s18  }
   0x3   : > { %p32_p1 = scmp.ge.s32.totalorder %s30_s21, 3  ;;  %p239_p2 = scmp.lt.s32.totalorder %s642_s20, 4 }
   0x5   : > { %s758_s21 = smov (%p32_p1, %s30_s21), 0  ;;  %p240_p3 = pnand %p569_p0, %p239_p2 }
   0x6   : > { %p294_p4 = scmp.lt.s32.totalorder (!%p240_p3), %s634_s18, 2  ;;  %p321_p5 = scmp.eq.s32.totalorder (!%p240_p3), %s634_s18, 0 }
   0x7   : > { %243 = sbr.rel (%p240_p3) target bundleno = 428 (0x1ac), region = 40 }
   0xc   : > { %s760_s18 = smov (!%p294_p4, %s634_s18), 2  ;;  %326 = sbr.rel (!%p321_p5) target bundleno = 290 (0x122), region = 44  ;;  %v327_v0 = vld [vmem:[%s749_s0] sm:$0xff] (%p321_p5)  ;;  %vm329_vm0 = vcmask (%p321_p5), 261120   ;;  %v328_v2 = vld [vmem:[%s749_s0 + $0x8] sm:$0xff] (%p321_p5)  ;;  %v644_v4 = vmov (%p321_p5), 32.0  }
   0xd   : > { %s579_s22 = sshll.u32 %s760_s18, 5  ;;  %s307_s25 = scalar_lea.vmem %s753_s4, %s760_s18  ;;  %v330_v1 = vsel (%p321_p5), %vm329_vm0, %v327_v0, 0.0  ;;  %v333_v3 = vsel (%p321_p5), %vm329_vm0, %v328_v2, 0.0  ;;  %613 = vrcp.f32 (%p321_p5), %v644_v4  ;;  %v611_v35 = vld [vmem:[%s750_s1] ss:$0 sm:$0xff] (%p321_p5) }
   0xe   : > { %s703_s28 = scalar_lea.vmem %s752_s3, %s579_s22  ;;  %s580_s29 = sshll.u32 %s760_s18, 4  ;;  %331 = vadd.xlane.f32.xlu0 (%p321_p5), %v330_v1  ;;  %v612_v38 = vld [vmem:[%s751_s2] ss:$0 sm:$0xff] (%p321_p5) }
   0xf   : > { %s709_s7 = scalar_lea.vmem %s754_s5, %s580_s29 }
  0x13   : > { %v614_v5 = vpop.eup %613 }
  0x14   : > { %v337_v6 = vmul.f32 32.0, %v614_v5  ;;  %vm341_vm1 = vweird.f32 %v614_v5 }
  0x16   : > { %334 = vadd.xlane.f32.xlu0 %v333_v3  ;;  %v338_v7 = vsub.f32 1.0, %v337_v6 }
  0x18   : > { %v339_v8 = vmul.f32 %v614_v5, %v338_v7 }
  0x1a   : > { %v340_v9 = vadd.f32 %v614_v5, %v339_v8 }
  0x1c   : > { %v342_v10 = vsel %vm341_vm1, %v614_v5, %v340_v9 }
  0x81   : > { %v332_v11 = vpop.xlane.xlu0 %331 }
  0x82   : > { %v343_v12 = vmul.f32 %v342_v10, %v332_v11 }
  0x84   : > { %v345_v13 = vsub.f32 %v327_v0, %v343_v12 }
  0x86   : > { %v347_v14 = vmul.f32 %v345_v13, %v345_v13 }
  0x88   : > { %v349_v15 = vsel %vm329_vm0, %v347_v14, 0.0 }
  0x89   : > { %350 = vadd.xlane.f32.xlu1 %v349_v15  ;;  %v335_v16 = vpop.xlane.xlu0 %334 }
  0x8a   : > { %v344_v17 = vmul.f32 %v342_v10, %v335_v16 }
  0x8c   : > { %v346_v18 = vsub.f32 %v328_v2, %v344_v17 }
  0x8e   : > { %v348_v19 = vmul.f32 %v346_v18, %v346_v18 }
  0x90   : > { %v352_v20 = vsel %vm329_vm0, %v348_v19, 0.0 }
  0x91   : > { %353 = vadd.xlane.f32.xlu1 %v352_v20 }
  0xfc   : > { %v351_v21 = vpop.xlane.xlu1 %350 }
  0xfd   : > { %v355_v22 = vmul.f32 %v351_v21, %v342_v10 }
  0xff   : > { %v357_v23 = vadd.f32 1e-05, %v355_v22 }
 0x101   : > { %615 = vrsqrt.f32 %v357_v23  ;;  %vm365_vm3 = vweird.f32 %v357_v23 }
 0x104   : > { %v354_v24 = vpop.xlane.xlu1 %353 }
 0x105   : > { %v356_v25 = vmul.f32 %v354_v24, %v342_v10 }
 0x107   : > { %v616_v26 = vpop.eup %615  ;;  %v358_v27 = vadd.f32 1e-05, %v356_v25 }
 0x108   : > { %v360_v28 = vmul.f32 %v616_v26, %v357_v23  ;;  %vm366_vm2 = vweird.f32 %v616_v26 }
 0x109   : > { %617 = vrsqrt.f32 %v358_v27  ;;  %vm367_vm4 = vmor %vm365_vm3, %vm366_vm2  ;;  %vm375_vm6 = vweird.f32 %v358_v27 }
 0x10a   : > { %v361_v29 = vmul.f32 %v616_v26, %v360_v28 }
 0x10c   : > { %v362_v30 = vmul.f32 0.5, %v361_v29 }
 0x10e   : > { %v363_v31 = vsub.f32 1.5, %v362_v30 }
 0x10f   : > { %v618_v32 = vpop.eup %617 }
 0x110   : > { %v364_v33 = vmul.f32 %v616_v26, %v363_v31  ;;  %v370_v34 = vmul.f32 %v618_v32, %v358_v27  ;;  %vm376_vm5 = vweird.f32 %v618_v32 }
 0x111   : > { %vm377_vm7 = vmor %vm375_vm6, %vm376_vm5 }
 0x112   : > { %v368_v36 = vsel %vm367_vm4, %v616_v26, %v364_v33  ;;  %v371_v37 = vmul.f32 %v618_v32, %v370_v34 }
 0x113   : > { %v379_v39 = vmul.f32 %v368_v36, %v345_v13 }
 0x114   : > { %v372_v40 = vmul.f32 0.5, %v371_v37 }
 0x115   : > { %v385_v41 = vmul.f32 %v611_v35, %v379_v39 }
 0x116   : > { %v373_v42 = vsub.f32 1.5, %v372_v40 }
 0x117   : > { %v391_v43 = vadd.f32 %v612_v38, %v385_v41 }
 0x118   : > { %v374_v44 = vmul.f32 %v618_v32, %v373_v42 }
 0x119   : > { %393 = vst.msk [vmem:[#allocation2] sm:$0xff] %vm329_vm0, %v391_v43 }
 0x11a   : > { %v378_v45 = vsel %vm377_vm7, %v618_v32, %v374_v44 }
 0x11b   : > { %v380_v46 = vmul.f32 %v378_v45, %v346_v18 }
 0x11d   : > { %v386_v47 = vmul.f32 %v611_v35, %v380_v46 }
 0x11f   : > { %v392_v48 = vadd.f32 %v612_v38, %v386_v47 }
 0x121   : > { %394 = vst.msk [vmem:[#allocation2 + $0x8] sm:$0xff] %vm329_vm0, %v392_v48 }
 0x122 PF: > { %v400_v49 = vld [vmem:[%s703_s28 + $0x18] sm:$0xff]  ;;  %v399_v50 = vld [vmem:[%s703_s28 + $0x10] sm:$0xff]  ;;  %v398_v51 = vld [vmem:[%s703_s28 + $0x8] sm:$0xff]  ;;  %vm405_vm8 = vcmask 261120  }
 0x123   : > { %424 = vmatpush.msra.mxu0 %v400_v49  ;;  %582 = vmatpush.msra.mxu1 %v400_v49  ;;  %v397_v52 = vld [vmem:[%s703_s28] sm:$0xff] }
 0x124   : > { %v395_v53 = vld [vmem:[#allocation2] sm:$0xff] }
 0x125   : > { %425 = vmatpush.msra.mxu0 %v399_v50  ;;  %583 = vmatpush.msra.mxu1 %v399_v50  ;;  %v619_v55 = vld [vmem:[%s307_s25] ss:$0 sm:$0xff] }
 0x127   : > { %426 = vmatpush.msra.mxu0 %v398_v51  ;;  %584 = vmatpush.msra.mxu1 %v398_v51 }
 0x128   : > { %v396_v54 = vld [vmem:[#allocation2 + $0x8] sm:$0xff] }
 0x129   : > { %427 = vmatpush.msra.mxu0 %v397_v52  ;;  %585 = vmatpush.msra.mxu1 %v397_v52 }
 0x12a   : > { %575 = vmatmul.msk.f32.vlgmr.msra.gmra.mxu0 %vm405_vm8, %v395_v53  ;;  %576 = vmatmul.msk.f32.vlgmr.msra.gmra.mxu1 %vm405_vm8, %v396_v54 }
 0x1a7   : > { %v429_v56 = vpop.f32.mrf.mxu0  ;;  %v432_v57 = vpop.f32.mrf.mxu1 }
 0x1a8   : > { %v430_v58 = vadd.f32 %v619_v55, %v429_v56  ;;  %v433_v59 = vadd.f32 %v619_v55, %v432_v57 }
 0x1aa   : > { %435 = vst.msk [vmem:[%s709_s7] sm:$0xff] %vm405_vm8, %v430_v58 }
 0x1ab   : > { %436 = vst.msk [vmem:[%s709_s7 + $0x8] sm:$0xff] %vm405_vm8, %v433_v59 }
 0x1ac PF: > { %s15_s20 = sadd.s32 1, %s642_s20   ;;  %s755_s18 = smov %s638_s19 }
 0x1ad   : > { %p12_p6 = scmp.ge.s32.totalorder %s15_s20, 5   ;;  %s756_s19 = smov %s758_s21 }
 0x1af   :  { %14 = sbr.rel (!%p12_p6) target bundleno = 2 (0x2), region = 80 }

// kernel: text_encoder_forward.14
= control target key start
LH: loop header
LB: loop body
LE: loop exit
PB: predicated region body
PF: predicated region fallthrough
CT: control target
= control target key end

     0   :  { %vm28_vm0 = vcmask 261120   ;;  %v208_v4 = vmov 32.0   ;;  %s280_s0 = inlined_call_operand.vmem [shape: f32[16,32], index: 0, kind: input, shape index: {}]   ;;  %s281_s1 = inlined_call_operand.vmem [shape: f32[1,32], index: 1, kind: input, shape index: {}]   ;;  %s282_s2 = inlined_call_operand.vmem [shape: f32[1,32], index: 2, kind: input, shape index: {}]   ;;  %s283_s4 = inlined_call_operand.vmem [shape: f32[1,1,128], index: 4, kind: input, shape index: {}]   ;;  %s284_s3 = inlined_call_operand.vmem [shape: f32[1,32,128], index: 3, kind: input, shape index: {}]   ;;  %s285_s5 = inlined_call_operand.vmem [shape: f32[1,16,128], index: 5, kind: output, shape index: {}]  }
   0x1   :  { %v26_v0 = vld [vmem:[%s280_s0] sm:$0xff]  ;;  %v27_v2 = vld [vmem:[%s280_s0 + $0x8] sm:$0xff]  ;;  %194 = vrcp.f32 %v208_v4  ;;  %v99_v21 = vld [vmem:[%s284_s3 + $0x18] sm:$0xff] }
   0x2   :  { %v29_v1 = vsel %vm28_vm0, %v26_v0, 0.0  ;;  %v32_v3 = vsel %vm28_vm0, %v27_v2, 0.0  ;;  %123 = vmatpush.msra.mxu0 %v99_v21  ;;  %186 = vmatpush.msra.mxu1 %v99_v21  ;;  %v98_v22 = vld [vmem:[%s284_s3 + $0x10] sm:$0xff]  ;;  %v97_v25 = vld [vmem:[%s284_s3 + $0x8] sm:$0xff]  ;;  %v96_v27 = vld [vmem:[%s284_s3] sm:$0xff] }
   0x3   :  { %30 = vadd.xlane.f32.xlu0 %v29_v1  ;;  %v191_v39 = vld [vmem:[%s281_s1] ss:$0 sm:$0xff] }
   0x4   :  { %124 = vmatpush.msra.mxu0 %v98_v22  ;;  %187 = vmatpush.msra.mxu1 %v98_v22  ;;  %v192_v42 = vld [vmem:[%s282_s2] ss:$0 sm:$0xff] }
   0x5   :  { %v193_v55 = vld [vmem:[%s283_s4] ss:$0 sm:$0xff] }
   0x6   :  { %125 = vmatpush.msra.mxu0 %v97_v25  ;;  %188 = vmatpush.msra.mxu1 %v97_v25 }
   0x7   :  { %v195_v5 = vpop.eup %194 }
   0x8   :  { %v36_v6 = vmul.f32 32.0, %v195_v5  ;;  %vm40_vm1 = vweird.f32 %v195_v5  ;;  %126 = vmatpush.msra.mxu0 %v96_v27  ;;  %189 = vmatpush.msra.mxu1 %v96_v27 }
   0xa   :  { %v37_v7 = vsub.f32 1.0, %v36_v6 }
   0xb   :  { %33 = vadd.xlane.f32.xlu0 %v32_v3 }
   0xc   :  { %v38_v8 = vmul.f32 %v195_v5, %v37_v7 }
   0xe   :  { %v39_v9 = vadd.f32 %v195_v5, %v38_v8 }
  0x10   :  { %v41_v10 = vsel %vm40_vm1, %v195_v5, %v39_v9 }
  0x76   :  { %v31_v11 = vpop.xlane.xlu0 %30 }
  0x77   :  { %v42_v12 = vmul.f32 %v41_v10, %v31_v11 }
  0x79   :  { %v44_v13 = vsub.f32 %v26_v0, %v42_v12 }
  0x7b   :  { %v46_v14 = vmul.f32 %v44_v13, %v44_v13 }
  0x7d   :  { %v48_v15 = vsel %vm28_vm0, %v46_v14, 0.0 }
  0x7e   :  { %49 = vadd.xlane.f32.xlu1 %v48_v15  ;;  %v34_v16 = vpop.xlane.xlu0 %33 }
  0x7f   :  { %v43_v17 = vmul.f32 %v41_v10, %v34_v16 }
  0x81   :  { %v45_v18 = vsub.f32 %v27_v2, %v43_v17 }
  0x83   :  { %v47_v19 = vmul.f32 %v45_v18, %v45_v18 }
  0x85   :  { %v51_v20 = vsel %vm28_vm0, %v47_v19, 0.0 }
  0x86   :  { %52 = vadd.xlane.f32.xlu1 %v51_v20 }
  0xf1   :  { %v50_v23 = vpop.xlane.xlu1 %49 }
  0xf2   :  { %v54_v24 = vmul.f32 %v50_v23, %v41_v10 }
  0xf4   :  { %v56_v26 = vadd.f32 1e-05, %v54_v24 }
  0xf6   :  { %196 = vrsqrt.f32 %v56_v26  ;;  %vm64_vm3 = vweird.f32 %v56_v26 }
  0xf9   :  { %v53_v28 = vpop.xlane.xlu1 %52 }
  0xfa   :  { %v55_v29 = vmul.f32 %v53_v28, %v41_v10 }
  0xfc   :  { %v197_v30 = vpop.eup %196  ;;  %v57_v31 = vadd.f32 1e-05, %v55_v29 }
  0xfd   :  { %v59_v32 = vmul.f32 %v197_v30, %v56_v26  ;;  %vm65_vm2 = vweird.f32 %v197_v30 }
  0xfe   :  { %198 = vrsqrt.f32 %v57_v31  ;;  %vm66_vm4 = vmor %vm64_vm3, %vm65_vm2  ;;  %vm74_vm6 = vweird.f32 %v57_v31 }
  0xff   :  { %v60_v33 = vmul.f32 %v197_v30, %v59_v32 }
 0x101   :  { %v61_v34 = vmul.f32 0.5, %v60_v33 }
 0x103   :  { %v62_v35 = vsub.f32 1.5, %v61_v34 }
 0x104   :  { %v199_v36 = vpop.eup %198 }
 0x105   :  { %v63_v37 = vmul.f32 %v197_v30, %v62_v35  ;;  %v69_v38 = vmul.f32 %v199_v36, %v57_v31  ;;  %vm75_vm5 = vweird.f32 %v199_v36 }
 0x106   :  { %vm76_vm7 = vmor %vm74_vm6, %vm75_vm5 }
 0x107   :  { %v67_v40 = vsel %vm66_vm4, %v197_v30, %v63_v37  ;;  %v70_v41 = vmul.f32 %v199_v36, %v69_v38 }
 0x108   :  { %v78_v43 = vmul.f32 %v67_v40, %v44_v13 }
 0x109   :  { %v71_v44 = vmul.f32 0.5, %v70_v41 }
 0x10a   :  { %v84_v45 = vmul.f32 %v191_v39, %v78_v43 }
 0x10b   :  { %v72_v46 = vsub.f32 1.5, %v71_v44 }
 0x10c   :  { %v90_v47 = vadd.f32 %v192_v42, %v84_v45 }
 0x10d   :  { %v73_v48 = vmul.f32 %v199_v36, %v72_v46 }
 0x10e   :  { %92 = vst.msk [vmem:[#allocation2] sm:$0xff] %vm28_vm0, %v90_v47 }
 0x10f   :  { %v77_v49 = vsel %vm76_vm7, %v199_v36, %v73_v48 }
 0x110   :  { %v79_v50 = vmul.f32 %v77_v49, %v45_v18 }
 0x112   :  { %v85_v51 = vmul.f32 %v191_v39, %v79_v50 }
 0x114   :  { %v91_v52 = vadd.f32 %v192_v42, %v85_v51 }
 0x115   :  { %v94_v53 = vld [vmem:[#allocation2] sm:$0xff] }
 0x116   :  { %93 = vst.msk [vmem:[#allocation2 + $0x8] sm:$0xff] %vm28_vm0, %v91_v52  ;;  %182 = vmatmul.msk.f32.vlgmr.msra.gmra.mxu0 %vm28_vm0, %v94_v53 }
 0x11d   :  { %v95_v54 = vld [vmem:[#allocation2 + $0x8] sm:$0xff] }
 0x11e   :  { %183 = vmatmul.msk.f32.vlgmr.msra.gmra.mxu1 %vm28_vm0, %v95_v54 }
 0x193   :  { %v128_v56 = vpop.f32.mrf.mxu0 }
 0x194   :  { %v129_v57 = vadd.f32 %v193_v55, %v128_v56 }
 0x196   :  { %v184_v58 = vmul.f32 -1.702, %v129_v57 }
 0x198   :  { %v138_v59 = vmul.f32 1.442695, %v184_v58 }
 0x19a   :  { %200 = vpow2.f32 %v138_v59 }
 0x19b   :  { %v131_v60 = vpop.f32.mrf.mxu1 }
 0x19c   :  { %v132_v61 = vadd.f32 %v193_v55, %v131_v60 }
 0x19e   :  { %v185_v62 = vmul.f32 -1.702, %v132_v61 }
 0x1a0   :  { %v201_v63 = vpop.eup %200  ;;  %v140_v0 = vmul.f32 1.442695, %v185_v62 }
 0x1a1   :  { %v142_v1 = vadd.f32 1.0, %v201_v63 }
 0x1a2   :  { %202 = vpow2.f32 %v140_v0 }
 0x1a3   :  { %204 = vrcp.f32 %v142_v1  ;;  %v155_v7 = vand.u32 2147483648, %v142_v1  ;;  %v153_v9 = vand.u32 2147483647, %v142_v1  ;;  %vm149_vm9 = vweird.f32 %v142_v1 }
 0x1a5   :  { %v156_v12 = vor.u32 1.1754944e-38, %v155_v7  ;;  %vm154_vm11 = vcmp.eq.f32.partialorder %v153_v9, 8.507059e+37 }
 0x1a8   :  { %v203_v2 = vpop.eup %202 }
 0x1a9   :  { %v205_v3 = vpop.eup %204  ;;  %v143_v4 = vadd.f32 1.0, %v203_v2 }
 0x1aa   :  { %v145_v5 = vmul.f32 %v205_v3, %v142_v1  ;;  %vm150_vm8 = vweird.f32 %v205_v3 }
 0x1ab   :  { %206 = vrcp.f32 %v143_v4  ;;  %vm151_vm10 = vmor %vm149_vm9, %vm150_vm8  ;;  %v170_v18 = vand.u32 2147483648, %v143_v4  ;;  %v168_v20 = vand.u32 2147483647, %v143_v4  ;;  %vm164_vm13 = vweird.f32 %v143_v4 }
 0x1ac   :  { %v146_v6 = vsub.f32 1.0, %v145_v5 }
 0x1ad   :  { %v171_v22 = vor.u32 1.1754944e-38, %v170_v18  ;;  %vm169_vm15 = vcmp.eq.f32.partialorder %v168_v20, 8.507059e+37 }
 0x1ae   :  { %v147_v8 = vmul.f32 %v205_v3, %v146_v6 }
 0x1b0   :  { %v148_v10 = vadd.f32 %v205_v3, %v147_v8 }
 0x1b1   :  { %v207_v11 = vpop.eup %206 }
 0x1b2   :  { %v152_v13 = vsel %vm151_vm10, %v205_v3, %v148_v10  ;;  %v160_v14 = vmul.f32 %v207_v11, %v143_v4  ;;  %vm165_vm12 = vweird.f32 %v207_v11 }
 0x1b3   :  { %v157_v15 = vsel %vm154_vm11, %v156_v12, %v152_v13  ;;  %vm166_vm14 = vmor %vm164_vm13, %vm165_vm12 }
 0x1b4   :  { %v174_v16 = vmul.f32 %v157_v15, %v129_v57  ;;  %v161_v17 = vsub.f32 1.0, %v160_v14 }
 0x1b6   :  { %176 = vst [vmem:[%s285_s5] sm:$0xff] %v174_v16  ;;  %v162_v19 = vmul.f32 %v207_v11, %v161_v17 }
 0x1b8   :  { %v163_v21 = vadd.f32 %v207_v11, %v162_v19 }
 0x1ba   :  { %v167_v23 = vsel %vm166_vm14, %v207_v11, %v163_v21 }
 0x1bb   :  { %v172_v24 = vsel %vm169_vm15, %v171_v22, %v167_v23 }
 0x1bc   :  { %v175_v25 = vmul.f32 %v172_v24, %v132_v61 }
 0x1be   :  { %177 = vst [vmem:[%s285_s5 + $0x8] sm:$0xff] %v175_v25 }

// kernel: text_encoder_forward.12
= control target key start
LH: loop header
LB: loop body
LE: loop exit
PB: predicated region body
PF: predicated region fallthrough
CT: control target
= control target key end

     0   :  { %s745_s6 = smov 0   ;;  %s747_s7 = smov 0   ;;  %s848_s0 = inlined_call_operand.vmem [shape: f32[3,2,8,32], index: 0, kind: input, shape index: {}]   ;;  %s849_s1 = inlined_call_operand.vmem [shape: f32[2,8,32], index: 1, kind: output, shape index: {}]  }
   0x1   :  { %s749_s8 = smov 0   ;;  %s751_s9 = smov 0  }
   0x2   :  { %s753_s10 = smov 0  }
   0x3 LB: > { %s23_s11 = sadd.s32 1, %s723_s9  ;;  %p39_p1 = scmp.ne.s32.totalorder %s715_s7, %s711_s6  ;;  %s727_s10 = sphi %s753_s10, %s11_s10   ;;  %s723_s9 = sphi %s751_s9, %s853_s9   ;;  %s719_s8 = sphi %s749_s8, %s852_s8   ;;  %s715_s7 = sphi %s747_s7, %s851_s7   ;;  %s711_s6 = sphi %s745_s6, %s850_s6  }
   0x4   : > { %p25_p0 = scmp.ge.s32.totalorder %s23_s11, 2  ;;  %p40_p2 = scmp.eq.s32.totalorder %s727_s10, 0 }
   0x5   : > { %s32_s13 = sadd.s32 1, %s715_s7  ;;  %p605_p5 = scmp.ge.s32.totalorder %s727_s10, 2 }
   0x6   : > { %s855_s11 = smov (%p25_p0, %s23_s11), 0  ;;  %p41_p3 = por %p40_p2, %p39_p1 }
   0x7   : > { %s27_s12 = ssub.s32 %s723_s9, %s855_s11  ;;  %93 = sbr.rel (%p605_p5) target bundleno = 19 (0x13), region = 16 }
   0x8   : > { %p30_p4 = scmp.eq.s32.totalorder %s27_s12, 0 }
   0xa   : > { %s780_s14 = scalar_select %p30_p4, %s715_s7, %s32_s13  }
   0xc   : > { %96 = sbr.rel (!%p41_p3) target bundleno = 19 (0x13), region = 20  ;;  %s98_s15 = sand.u32 (%p41_p3), 1, %s715_s7  }
   0xd   : > { %s606_s16 = sshll.u32 (%p41_p3), %s723_s9, 3  ;;  %s625_s17 = smul.u32 (%p41_p3), 24, %s98_s15 }
   0xe   : > { %s103_s20 = scalar_lea.vmem (%p41_p3), %s848_s0, %s606_s16 }
   0xf   : > { %v136_v0 = vld [vmem:[%s103_s20] sm:$0xff] (%p41_p3)  ;;  %v138_v1 = vld [vmem:[%s103_s20 + $0x10] sm:$0xff] (%p41_p3)  ;;  %s100_s21 = scalar_lea.vmem (%p41_p3), [#allocation2], %s625_s17 }
  0x10   : > { %v140_v2 = vld [vmem:[%s103_s20 + $0x20] sm:$0xff] (%p41_p3)  ;;  %137 = vst [vmem:[%s100_s21] sm:$0xff] (%p41_p3), %v136_v0 }
  0x11   : > { %139 = vst [vmem:[%s100_s21 + $0x8] sm:$0xff] %v138_v1 }
  0x12   : > { %141 = vst [vmem:[%s100_s21 + $0x10] sm:$0xff] %v140_v2 }
  0x13 PF: > { %p607_p6 = scmp.ge.s32.totalorder %s727_s10, 1  ;;  %p146_p7 = scmp.lt.s32.totalorder %s727_s10, 3 }
  0x15   : > { %p147_p8 = pnand %p607_p6, %p146_p7 }
  0x16   : > { %s153_s22 = sand.u32 (!%p147_p8), 1, %s711_s6   ;;  %s729_s25 = smov (!%p147_p8), 104  }
  0x17   : > { %150 = sbr.rel (%p147_p8) target bundleno = 819 (0x333), region = 58  ;;  %s730_s26 = smov (!%p147_p8), 120  }
  0x18   : > { %s626_s23 = smul.u32 (!%p147_p8), 24, %s153_s22  ;;  %s731_s27 = smov (!%p147_p8), 112  }
  0x19   : > { %s732_s28 = smov (!%p147_p8), 24   ;;  %s733_s29 = smov (!%p147_p8), 8  }
  0x1a   : > { %s155_s24 = scalar_lea.vmem (!%p147_p8), [#allocation2], %s626_s23  ;;  %s734_s30 = smov (!%p147_p8), 16  }
  0x1b   : > { %p174_p9 = scmp.lt.s32.totalorder (!%p147_p8), %s719_s8, 1 }
  0x1c   : > { %vm192_vm0 = vcmask 64512   ;;  %v609_v3 = vld [vmem:[%s155_s24 + $0x8] sm:$0xff]  ;;  %v181_v4 = vld [vmem:[%s155_s24] sm:$0xff]  ;;  %v187_v8 = vlaneseq  ;;  %v610_v16 = vld [vmem:[%s155_s24 + $0x10] sm:$0xff] }
  0x1d   : > { %611 = vmatpush.xpose.msk.msra.mxu0 %vm192_vm0, %v609_v3  ;;  %v182_v5 = vmul.f32 0.35355338, %v181_v4  ;;  %428 = vrot.lane.b32.xlu2 %v609_v3, %s729_s25  ;;  %s857_s8 = smov (!%p174_p9, %s719_s8), 1 }
  0x1e   : > { %v188_v9 = vshrl.u32 %v187_v8, 7  ;;  %v190_v10 = vand.u32 127, %v187_v8  ;;  %247 = vmatpush.msra.mxu1 %v610_v16  ;;  %s608_s2 = sshll.u32 %s857_s8, 3 }
  0x1f   : > { %267 = vrot.lane.b32.xlu1 %v182_v5, %s730_s26  ;;  %s180_s5 = scalar_lea.vmem %s849_s1, %s608_s2 }
  0x20   : > { %612 = vmatmul.msk.f32.vlgmr.msra.gmra.mxu0 %vm192_vm0, %v182_v5  ;;  %vm191_vm1 = vcmp.le.s32.totalorder %v190_v10, %v188_v9 }
  0x25   : > { %347 = vrot.lane.b32.xlu2 %v182_v5, %s731_s27 }
  0x27   : > { %349 = vrot.lane.b32.xlu1 %v609_v3, %s731_s27 }
  0x2f   : > { %426 = vrot.lane.b32.xlu1 %v182_v5, %s729_s25 }
  0x77   : > { %v429_v6 = vpop.permute.xlu2 %428 }
  0x78   : > { %620 = vmatpush.xpose.msk.msrb.mxu0 %vm192_vm0, %v429_v6 }
  0x7f   : > { %v348_v24 = vpop.permute.xlu2 %347 }
  0x91   : > { %v268_v7 = vpop.permute.xlu1 %267 }
  0x99   : > { %v350_v11 = vpop.permute.xlu1 %349 }
  0x9a   : > { %617 = vmatpush.xpose.msk.msrb.mxu1 %vm192_vm0, %v350_v11 }
  0x9d   : > { %v216_v12 = vpop.f32.mrf.mxu0 }
  0x9e   : > { %v219_v13 = vsel %vm191_vm1, %v216_v12, -inf }
  0x9f   : > { %v220_v14 = vsel %vm192_vm0, %v219_v13, -inf }
  0xa0   : > { %221 = vmax.xlane.f32.xlu0 %v220_v14 }
  0xa1   : > { %v427_v15 = vpop.permute.xlu1 %426 }
  0xa2   : > { %621 = vmatmul.msk.f32.vlgmr.msrb.gmra.mxu0 %vm192_vm0, %v427_v15 }
  0xb4   : > { %269 = vrot.lane.b32.xlu0 %v609_v3, %s730_s26 }
 0x113   : > { %v222_v17 = vpop.xlane.xlu0 %221 }
 0x114   : > { %v223_v18 = vsub.f32 %v219_v13, %v222_v17 }
 0x116   : > { %v224_v19 = vmul.f32 1.442695, %v223_v18 }
 0x118   : > { %673 = vpow2.f32 %v224_v19 }
 0x11e   : > { %v674_v20 = vpop.eup %673 }
 0x11f   : > { %613 = vmatmul.msk.f32.vlgmr.msra.gmra.mxu1 %vm192_vm0, %v674_v20  ;;  %v451_v21 = vpop.f32.mrf.mxu0  ;;  %v226_v51 = vsel %vm192_vm0, %v674_v20, 0.0 }
 0x120   : > { %v454_v22 = vsel %vm191_vm1, %v451_v21, -inf }
 0x121   : > { %v455_v23 = vsel %vm192_vm0, %v454_v22, -inf }
 0x122   : > { %456 = vmax.xlane.f32.xlu0 %v455_v23 }
 0x126   : > { %v270_v25 = vpop.permute.xlu0 %269 }
 0x127   : > { %614 = vmatpush.xpose.msk.msra.mxu2 %vm192_vm0, %v270_v25  ;;  %618 = vmatmul.msk.f32.vlgmr.msrb.gmra.mxu1 %vm192_vm0, %v348_v24 }
 0x12a   : > { %615 = vmatmul.msk.f32.vlgmr.msra.gmra.mxu2 %vm192_vm0, %v268_v7 }
 0x136   : > { %464 = vrot.lane.b32.xlu0 %v610_v16, %s729_s25 }
 0x195   : > { %v457_v26 = vpop.xlane.xlu0 %456 }
 0x196   : > { %v458_v27 = vsub.f32 %v454_v22, %v457_v26 }
 0x198   : > { %v459_v29 = vmul.f32 1.442695, %v458_v27 }
 0x19a   : > { %675 = vpow2.f32 %v459_v29 }
 0x19c   : > { %v811_v28 = vpop.f32.mrf.mxu1 }
 0x1a0   : > { %v676_v33 = vpop.eup %675 }
 0x1a1   : > { %v461_v38 = vsel %vm192_vm0, %v676_v33, 0.0 }
 0x1a4   : > { %v372_v30 = vpop.f32.mrf.mxu1 }
 0x1a5   : > { %v375_v31 = vsel %vm191_vm1, %v372_v30, -inf }
 0x1a6   : > { %v376_v32 = vsel %vm192_vm0, %v375_v31, -inf }
 0x1a7   : > { %377 = vmax.xlane.f32.xlu1 %v376_v32 }
 0x1a8   : > { %v465_v34 = vpop.permute.xlu0 %464 }
 0x1a9   : > { %485 = vmatpush.msrb.mxu2 %v465_v34 }
 0x1aa   : > { %622 = vmatmul.msk.f32.vlgmr.msrb.gmra.mxu2 %vm192_vm0, %v676_v33 }
 0x1ad   : > { %v292_v35 = vpop.f32.mrf.mxu2 }
 0x1ae   : > { %v295_v36 = vsel %vm191_vm1, %v292_v35, -inf }
 0x1af   : > { %v296_v37 = vsel %vm192_vm0, %v295_v36, -inf }
 0x1b0   : > { %297 = vmax.xlane.f32.xlu2 %v296_v37 }
 0x1c0   : > { %385 = vrot.lane.b32.xlu1 %v610_v16, %s731_s27 }
 0x1c8   : > { %306 = vrot.lane.b32.xlu2 %v610_v16, %s730_s26 }
 0x1ea   : > { %462 = vadd.xlane.f32.xlu1 %v461_v38 }
 0x21a   : > { %v378_v39 = vpop.xlane.xlu1 %377 }
 0x21b   : > { %v379_v40 = vsub.f32 %v375_v31, %v378_v39 }
 0x21d   : > { %v380_v41 = vmul.f32 1.442695, %v379_v40 }
 0x21f   : > { %677 = vpow2.f32 %v380_v41 }
 0x223   : > { %v298_v42 = vpop.xlane.xlu2 %297 }
 0x224   : > { %v299_v43 = vsub.f32 %v295_v36, %v298_v42 }
 0x225   : > { %v678_v44 = vpop.eup %677 }
 0x226   : > { %v300_v45 = vmul.f32 1.442695, %v299_v43  ;;  %v382_v46 = vsel %vm192_vm0, %v678_v44, 0.0 }
 0x227   : > { %383 = vadd.xlane.f32.xlu0 %v382_v46 }
 0x228   : > { %679 = vpow2.f32 %v300_v45 }
 0x22b   : > { %v307_v47 = vpop.permute.xlu2 %306 }
 0x22c   : > { %327 = vmatpush.msra.mxu3 %v307_v47 }
 0x22d   : > { %v487_v62 = vpop.f32.mrf.mxu2 }
 0x22e   : > { %v680_v48 = vpop.eup %679 }
 0x22f   : > { %616 = vmatmul.msk.f32.vlgmr.msra.gmra.mxu3 %vm192_vm0, %v680_v48  ;;  %v302_v49 = vsel %vm192_vm0, %v680_v48, 0.0 }
 0x230   : > { %303 = vadd.xlane.f32.xlu2 %v302_v49 }
 0x232   : > { %v386_v50 = vpop.permute.xlu1 %385 }
 0x233   : > { %406 = vmatpush.msrb.mxu3 %v386_v50 }
 0x237   : > { %619 = vmatmul.msk.f32.vlgmr.msrb.gmra.mxu3 %vm192_vm0, %v678_v44 }
 0x238   : > { %227 = vadd.xlane.f32.xlu2 %v226_v51 }
 0x25d   : > { %v463_v52 = vpop.xlane.xlu1 %462 }
 0x25e   : > { %681 = vrcp.f32 %v463_v52  ;;  %v501_v56 = vand.u32 2147483648, %v463_v52  ;;  %v499_v58 = vand.u32 2147483647, %v463_v52  ;;  %vm495_vm3 = vweird.f32 %v463_v52 }
 0x260   : > { %v502_v60 = vor.u32 1.1754944e-38, %v501_v56  ;;  %vm500_vm5 = vcmp.eq.f32.partialorder %v499_v58, 8.507059e+37 }
 0x264   : > { %v682_v53 = vpop.eup %681 }
 0x265   : > { %v491_v54 = vmul.f32 %v682_v53, %v463_v52  ;;  %vm496_vm2 = vweird.f32 %v682_v53 }
 0x266   : > { %vm497_vm4 = vmor %vm495_vm3, %vm496_vm2  ;;  %vm518_vm3 = vcmask 130048  }
 0x267   : > { %v492_v55 = vsub.f32 1.0, %v491_v54 }
 0x269   : > { %v493_v57 = vmul.f32 %v682_v53, %v492_v55 }
 0x26b   : > { %v494_v59 = vadd.f32 %v682_v53, %v493_v57 }
 0x26d   : > { %v498_v61 = vsel %vm497_vm4, %v682_v53, %v494_v59  ;;  %vm520_vm4 = vcmask 195584  }
 0x26e   : > { %v503_v63 = vsel %vm500_vm5, %v502_v60, %v498_v61  ;;  %vm522_vm5 = vcmask 261120  }
 0x26f   : > { %v504_v0 = vmul.f32 %v503_v63, %v487_v62 }
 0x271   : > { %514 = vrot.lane.b32.xlu1 %v504_v0, %s732_s28 }
 0x29a   : > { %v384_v1 = vpop.xlane.xlu0 %383 }
 0x29b   : > { %683 = vrcp.f32 %v384_v1  ;;  %v422_v19 = vand.u32 2147483648, %v384_v1  ;;  %vm416_vm11 = vweird.f32 %v384_v1  ;;  %v420_v21 = vand.u32 2147483647, %v384_v1 }
 0x29d   : > { %v423_v23 = vor.u32 1.1754944e-38, %v422_v19  ;;  %vm421_vm13 = vcmp.eq.f32.partialorder %v420_v21, 8.507059e+37 }
 0x2a1   : > { %v684_v3 = vpop.eup %683 }
 0x2a2   : > { %v412_v4 = vmul.f32 %v684_v3, %v384_v1  ;;  %vm417_vm10 = vweird.f32 %v684_v3 }
 0x2a3   : > { %v304_v2 = vpop.xlane.xlu2 %303  ;;  %vm418_vm12 = vmor %vm416_vm11, %vm417_vm10 }
 0x2a4   : > { %685 = vrcp.f32 %v304_v2  ;;  %v413_v6 = vsub.f32 1.0, %v412_v4  ;;  %v343_v9 = vand.u32 2147483648, %v304_v2  ;;  %v341_v11 = vand.u32 2147483647, %v304_v2 }
 0x2a5   : > { %vm337_vm7 = vweird.f32 %v304_v2 }
 0x2a6   : > { %v414_v12 = vmul.f32 %v684_v3, %v413_v6  ;;  %v344_v15 = vor.u32 1.1754944e-38, %v343_v9  ;;  %vm342_vm9 = vcmp.eq.f32.partialorder %v341_v11, 8.507059e+37 }
 0x2a8   : > { %v415_v17 = vadd.f32 %v684_v3, %v414_v12 }
 0x2aa   : > { %v686_v5 = vpop.eup %685  ;;  %v419_v22 = vsel %vm418_vm12, %v684_v3, %v415_v17 }
 0x2ab   : > { %v333_v7 = vmul.f32 %v686_v5, %v304_v2  ;;  %vm338_vm6 = vweird.f32 %v686_v5  ;;  %v424_v25 = vsel %vm421_vm13, %v423_v23, %v419_v22  ;;  %v228_v27 = vpop.xlane.xlu2 %227 }
 0x2ac   : > { %vm339_vm8 = vmor %vm337_vm7, %vm338_vm6  ;;  %687 = vrcp.f32 %v228_v27  ;;  %v263_v34 = vand.u32 2147483648, %v228_v27  ;;  %vm257_vm15 = vweird.f32 %v228_v27  ;;  %v261_v35 = vand.u32 2147483647, %v228_v27 }
 0x2ad   : > { %v334_v8 = vsub.f32 1.0, %v333_v7 }
 0x2ae   : > { %v264_v37 = vor.u32 1.1754944e-38, %v263_v34  ;;  %vm262_vm2 = vcmp.eq.f32.partialorder %v261_v35, 8.507059e+37 }
 0x2af   : > { %v335_v10 = vmul.f32 %v686_v5, %v334_v8 }
 0x2b1   : > { %v336_v13 = vadd.f32 %v686_v5, %v335_v10 }
 0x2b2   : > { %v329_v14 = vpop.f32.mrf.mxu3  ;;  %v688_v29 = vpop.eup %687 }
 0x2b3   : > { %v340_v16 = vsel %vm339_vm8, %v686_v5, %v336_v13  ;;  %v253_v30 = vmul.f32 %v688_v29, %v228_v27  ;;  %vm258_vm14 = vweird.f32 %v688_v29 }
 0x2b4   : > { %v345_v18 = vsel %vm342_vm9, %v344_v15, %v340_v16  ;;  %vm259_vm1 = vmor %vm257_vm15, %vm258_vm14 }
 0x2b5   : > { %v346_v20 = vmul.f32 %v345_v18, %v329_v14  ;;  %v254_v31 = vsub.f32 1.0, %v253_v30 }
 0x2b7   : > { %506 = vrot.lane.b32.xlu2 %v346_v20, %s733_s29  ;;  %v255_v32 = vmul.f32 %v688_v29, %v254_v31 }
 0x2b9   : > { %v256_v33 = vadd.f32 %v688_v29, %v255_v32 }
 0x2ba   : > { %v408_v24 = vpop.f32.mrf.mxu3 }
 0x2bb   : > { %v425_v26 = vmul.f32 %v424_v25, %v408_v24  ;;  %v260_v36 = vsel %vm259_vm1, %v688_v29, %v256_v33 }
 0x2bc   : > { %v265_v38 = vsel %vm262_vm2, %v264_v37, %v260_v36 }
 0x2bd   : > { %510 = vrot.lane.b32.xlu0 %v425_v26, %s734_s30  ;;  %v266_v40 = vmul.f32 %v265_v38, %v811_v28 }
 0x2e3   : > { %v515_v43 = vpop.permute.xlu1 %514 }
 0x311   : > { %v507_v39 = vpop.permute.xlu2 %506 }
 0x312   : > { %v517_v41 = vsel %vm192_vm0, %v266_v40, %v507_v39 }
 0x32f   : > { %v511_v42 = vpop.permute.xlu0 %510 }
 0x330   : > { %v519_v44 = vsel %vm518_vm3, %v517_v41, %v511_v42 }
 0x331   : > { %v521_v45 = vsel %vm520_vm4, %v519_v44, %v515_v43 }
 0x332   : > { %523 = vst.msk [vmem:[%s180_s5] sm:$0xff] %vm522_vm5, %v521_v45 }
 0x333 PF: > { %s11_s10 = sadd.s32 1, %s727_s10   ;;  %s850_s6 = smov %s715_s7 }
 0x334   : > { %p8_p10 = scmp.ge.s32.totalorder %s11_s10, 4   ;;  %s851_s7 = smov %s780_s14 }
 0x335   : > { %s852_s8 = smov %s723_s9  ;;  %s853_s9 = smov %s855_s11 }
 0x336   :  { %10 = sbr.rel (!%p8_p10) target bundleno = 3 (0x3), region = 99 }

// kernel: text_encoder_forward.15
= control target key start
LH: loop header
LB: loop body
LE: loop exit
PB: predicated region body
PF: predicated region fallthrough
CT: control target
= control target key end

     0   :  { %vm21_vm0 = vcmask 261120   ;;  %v111_v2 = vmov 0.0   ;;  %s212_s1 = inlined_call_operand.vmem [shape: f32[128,32], index: 1, kind: input, shape index: {}]   ;;  %s213_s2 = inlined_call_operand.vmem [shape: f32[1,32], index: 2, kind: input, shape index: {}]   ;;  %s214_s0 = inlined_call_operand.vmem [shape: f32[16,128], index: 0, kind: input, shape index: {}]   ;;  %s215_s3 = inlined_call_operand.vmem [shape: f32[16,32], index: 3, kind: input, shape index: {}]   ;;  %s216_s4 = inlined_call_operand.vmem [shape: f32[16,32], index: 4, kind: output, shape index: {}]  }
   0x1   :  { %v43_v0 = vld [vmem:[%s212_s1 + $0x78] sm:$0xff]  ;;  %v42_v1 = vld [vmem:[%s212_s1 + $0x70] sm:$0xff]  ;;  %22 = vst.msk [vmem:[#allocation2] sm:$0xff] %vm21_vm0, %v111_v2  ;;  %v41_v3 = vld [vmem:[%s212_s1 + $0x68] sm:$0xff] }
   0x2   :  { %44 = vmatpush.msra.mxu0 %v43_v0  ;;  %93 = vmatpush.msra.mxu1 %v43_v0  ;;  %23 = vst.msk [vmem:[#allocation2 + $0x8] sm:$0xff] %vm21_vm0, %v111_v2  ;;  %v40_v4 = vld [vmem:[%s212_s1 + $0x60] sm:$0xff]  ;;  %v39_v5 = vld [vmem:[%s212_s1 + $0x58] sm:$0xff]  ;;  %v38_v6 = vld [vmem:[%s212_s1 + $0x50] sm:$0xff] }
   0x3   :  { %v37_v7 = vld [vmem:[%s212_s1 + $0x48] sm:$0xff]  ;;  %v36_v8 = vld [vmem:[%s212_s1 + $0x40] sm:$0xff]  ;;  %v35_v9 = vld [vmem:[%s212_s1 + $0x38] sm:$0xff] }
   0x4   :  { %45 = vmatpush.msra.mxu0 %v42_v1  ;;  %94 = vmatpush.msra.mxu1 %v42_v1  ;;  %v34_v10 = vld [vmem:[%s212_s1 + $0x30] sm:$0xff]  ;;  %v33_v11 = vld [vmem:[%s212_s1 + $0x28] sm:$0xff]  ;;  %v32_v12 = vld [vmem:[%s212_s1 + $0x20] sm:$0xff] }
   0x5   :  { %v31_v13 = vld [vmem:[%s212_s1 + $0x18] sm:$0xff]  ;;  %v30_v14 = vld [vmem:[%s212_s1 + $0x10] sm:$0xff]  ;;  %v29_v15 = vld [vmem:[%s212_s1 + $0x8] sm:$0xff] }
   0x6   :  { %46 = vmatpush.msra.mxu0 %v41_v3  ;;  %95 = vmatpush.msra.mxu1 %v41_v3  ;;  %v28_v16 = vld [vmem:[%s212_s1] sm:$0xff]  ;;  %v27_v18 = vld [vmem:[%s214_s0 + $0x8] sm:$0xff] }
   0x7   :  { %v26_v17 = vld [vmem:[%s214_s0] sm:$0xff]  ;;  %v84_v29 = vld [vmem:[%s215_s3 + $0x8] sm:$0xff] }
   0x8   :  { %47 = vmatpush.msra.mxu0 %v40_v4  ;;  %96 = vmatpush.msra.mxu1 %v40_v4  ;;  %v24_v19 = vld [vmem:[#allocation2] sm:$0xff] }
   0x9   :  { %v25_v20 = vld [vmem:[#allocation2 + $0x8] sm:$0xff]  ;;  %v110_v25 = vld [vmem:[%s213_s2] ss:$0 sm:$0xff] }
   0xa   :  { %48 = vmatpush.msra.mxu0 %v39_v5  ;;  %97 = vmatpush.msra.mxu1 %v39_v5  ;;  %v83_v27 = vld [vmem:[%s215_s3] sm:$0xff] }
   0xc   :  { %49 = vmatpush.msra.mxu0 %v38_v6  ;;  %98 = vmatpush.msra.mxu1 %v38_v6 }
   0xe   :  { %50 = vmatpush.msra.mxu0 %v37_v7  ;;  %99 = vmatpush.msra.mxu1 %v37_v7 }
  0x10   :  { %51 = vmatpush.msra.mxu0 %v36_v8  ;;  %100 = vmatpush.msra.mxu1 %v36_v8 }
  0x12   :  { %52 = vmatpush.msra.mxu0 %v35_v9  ;;  %101 = vmatpush.msra.mxu1 %v35_v9 }
  0x14   :  { %53 = vmatpush.msra.mxu0 %v34_v10  ;;  %102 = vmatpush.msra.mxu1 %v34_v10 }
  0x16   :  { %54 = vmatpush.msra.mxu0 %v33_v11  ;;  %103 = vmatpush.msra.mxu1 %v33_v11 }
  0x18   :  { %55 = vmatpush.msra.mxu0 %v32_v12  ;;  %104 = vmatpush.msra.mxu1 %v32_v12 }
  0x1a   :  { %56 = vmatpush.msra.mxu0 %v31_v13  ;;  %105 = vmatpush.msra.mxu1 %v31_v13 }
  0x1c   :  { %57 = vmatpush.msra.mxu0 %v30_v14  ;;  %106 = vmatpush.msra.mxu1 %v30_v14 }
  0x1e   :  { %58 = vmatpush.msra.mxu0 %v29_v15  ;;  %107 = vmatpush.msra.mxu1 %v29_v15 }
  0x20   :  { %59 = vmatpush.msra.mxu0 %v28_v16  ;;  %108 = vmatpush.msra.mxu1 %v28_v16 }
  0x21   :  { %60 = vmatmul.f32.vlgmr.msra.gmra.mxu0 %v26_v17  ;;  %63 = vmatmul.f32.vlgmr.msra.gmra.mxu1 %v27_v18 }
  0x9e   :  { %v61_v21 = vpop.f32.mrf.mxu0  ;;  %v64_v22 = vpop.f32.mrf.mxu1 }
  0x9f   :  { %v67_v23 = vadd.f32 %v61_v21, %v24_v19  ;;  %v68_v24 = vadd.f32 %v64_v22, %v25_v20 }
  0xa1   :  { %70 = vst.msk [vmem:[#allocation2] sm:$0xff] %vm21_vm0, %v67_v23 }
  0xa2   :  { %71 = vst.msk [vmem:[#allocation2 + $0x8] sm:$0xff] %vm21_vm0, %v68_v24 }
  0xa8   :  { %v75_v26 = vld [vmem:[#allocation2] sm:$0xff] }
  0xa9   :  { %v81_v28 = vadd.f32 %v110_v25, %v75_v26  ;;  %v76_v30 = vld [vmem:[#allocation2 + $0x8] sm:$0xff] }
  0xaa   :  { %v82_v31 = vadd.f32 %v110_v25, %v76_v30 }
  0xab   :  { %v85_v32 = vadd.f32 %v83_v27, %v81_v28 }
  0xac   :  { %v86_v33 = vadd.f32 %v84_v29, %v82_v31 }
  0xad   :  { %87 = vst.msk [vmem:[%s216_s4] sm:$0xff] %vm21_vm0, %v85_v32 }
  0xae   :  { %88 = vst.msk [vmem:[%s216_s4 + $0x8] sm:$0xff] %vm21_vm0, %v86_v33 }

// kernel: text_encoder_forward.21
= control target key start
LH: loop header
LB: loop body
LE: loop exit
PB: predicated region body
PF: predicated region fallthrough
CT: control target
= control target key end

     0   :  { %vm16_vm0 = vcmask 261120   ;;  %v95_v4 = vmov 32.0   ;;  %s140_s0 = inlined_call_operand.vmem [shape: f32[16,32], index: 0, kind: input, shape index: {}]   ;;  %s141_s1 = inlined_call_operand.vmem [shape: f32[1,32], index: 1, kind: input, shape index: {}]   ;;  %s142_s2 = inlined_call_operand.vmem [shape: f32[1,32], index: 2, kind: input, shape index: {}]   ;;  %s143_s3 = inlined_call_operand.vmem [shape: f32[16,32], index: 3, kind: output, shape index: {}]  }
   0x1   :  { %v14_v0 = vld [vmem:[%s140_s0] sm:$0xff]  ;;  %v15_v2 = vld [vmem:[%s140_s0 + $0x8] sm:$0xff]  ;;  %89 = vrcp.f32 %v95_v4 }
   0x2   :  { %v17_v1 = vsel %vm16_vm0, %v14_v0, 0.0  ;;  %v20_v3 = vsel %vm16_vm0, %v15_v2, 0.0  ;;  %v87_v35 = vld [vmem:[%s141_s1] ss:$0 sm:$0xff] }
   0x3   :  { %18 = vadd.xlane.f32.xlu0 %v17_v1  ;;  %v88_v38 = vld [vmem:[%s142_s2] ss:$0 sm:$0xff] }
   0x7   :  { %v90_v5 = vpop.eup %89 }
   0x8   :  { %v24_v6 = vmul.f32 32.0, %v90_v5  ;;  %vm28_vm1 = vweird.f32 %v90_v5 }
   0xa   :  { %v25_v7 = vsub.f32 1.0, %v24_v6 }
   0xb   :  { %21 = vadd.xlane.f32.xlu0 %v20_v3 }
   0xc   :  { %v26_v8 = vmul.f32 %v90_v5, %v25_v7 }
   0xe   :  { %v27_v9 = vadd.f32 %v90_v5, %v26_v8 }
  0x10   :  { %v29_v10 = vsel %vm28_vm1, %v90_v5, %v27_v9 }
  0x76   :  { %v19_v11 = vpop.xlane.xlu0 %18 }
  0x77   :  { %v30_v12 = vmul.f32 %v29_v10, %v19_v11 }
  0x79   :  { %v32_v13 = vsub.f32 %v14_v0, %v30_v12 }
  0x7b   :  { %v34_v14 = vmul.f32 %v32_v13, %v32_v13 }
  0x7d   :  { %v36_v15 = vsel %vm16_vm0, %v34_v14, 0.0 }
  0x7e   :  { %37 = vadd.xlane.f32.xlu1 %v36_v15  ;;  %v22_v16 = vpop.xlane.xlu0 %21 }
  0x7f   :  { %v31_v17 = vmul.f32 %v29_v10, %v22_v16 }
  0x81   :  { %v33_v18 = vsub.f32 %v15_v2, %v31_v17 }
  0x83   :  { %v35_v19 = vmul.f32 %v33_v18, %v33_v18 }
  0x85   :  { %v39_v20 = vsel %vm16_vm0, %v35_v19, 0.0 }
  0x86   :  { %40 = vadd.xlane.f32.xlu1 %v39_v20 }
  0xf1   :  { %v38_v21 = vpop.xlane.xlu1 %37 }
  0xf2   :  { %v42_v22 = vmul.f32 %v38_v21, %v29_v10 }
  0xf4   :  { %v44_v23 = vadd.f32 1e-05, %v42_v22 }
  0xf6   :  { %91 = vrsqrt.f32 %v44_v23  ;;  %vm52_vm3 = vweird.f32 %v44_v23 }
  0xf9   :  { %v41_v24 = vpop.xlane.xlu1 %40 }
  0xfa   :  { %v43_v25 = vmul.f32 %v41_v24, %v29_v10 }
  0xfc   :  { %v92_v26 = vpop.eup %91  ;;  %v45_v27 = vadd.f32 1e-05, %v43_v25 }
  0xfd   :  { %v47_v28 = vmul.f32 %v92_v26, %v44_v23  ;;  %vm53_vm2 = vweird.f32 %v92_v26 }
  0xfe   :  { %93 = vrsqrt.f32 %v45_v27  ;;  %vm54_vm4 = vmor %vm52_vm3, %vm53_vm2  ;;  %vm62_vm6 = vweird.f32 %v45_v27 }
  0xff   :  { %v48_v29 = vmul.f32 %v92_v26, %v47_v28 }
 0x101   :  { %v49_v30 = vmul.f32 0.5, %v48_v29 }
 0x103   :  { %v50_v31 = vsub.f32 1.5, %v49_v30 }
 0x104   :  { %v94_v32 = vpop.eup %93 }
 0x105   :  { %v51_v33 = vmul.f32 %v92_v26, %v50_v31  ;;  %v57_v34 = vmul.f32 %v94_v32, %v45_v27  ;;  %vm63_vm5 = vweird.f32 %v94_v32 }
 0x106   :  { %vm64_vm7 = vmor %vm62_vm6, %vm63_vm5 }
 0x107   :  { %v55_v36 = vsel %vm54_vm4, %v92_v26, %v51_v33  ;;  %v58_v37 = vmul.f32 %v94_v32, %v57_v34 }
 0x108   :  { %v66_v39 = vmul.f32 %v55_v36, %v32_v13 }
 0x109   :  { %v59_v40 = vmul.f32 0.5, %v58_v37 }
 0x10a   :  { %v72_v41 = vmul.f32 %v87_v35, %v66_v39 }
 0x10b   :  { %v60_v42 = vsub.f32 1.5, %v59_v40 }
 0x10c   :  { %v78_v43 = vadd.f32 %v88_v38, %v72_v41 }
 0x10d   :  { %v61_v44 = vmul.f32 %v94_v32, %v60_v42 }
 0x10e   :  { %80 = vst.msk [vmem:[%s143_s3] sm:$0xff] %vm16_vm0, %v78_v43 }
 0x10f   :  { %v65_v45 = vsel %vm64_vm7, %v94_v32, %v61_v44 }
 0x110   :  { %v67_v46 = vmul.f32 %v65_v45, %v33_v18 }
 0x112   :  { %v73_v47 = vmul.f32 %v87_v35, %v67_v46 }
 0x114   :  { %v79_v48 = vadd.f32 %v88_v38, %v73_v47 }
 0x116   :  { %81 = vst.msk [vmem:[%s143_s3 + $0x8] sm:$0xff] %vm16_vm0, %v79_v48 }

</bundles_post_ra>
